<compile_context>
chip_gen: v7x
topology: tpu7x:2x2x1
jax: 0.10.0
libtpu: 0.0.40
codegen_flags: <defaults>
</compile_context>

<pallas_src>
import math

import jax
import jax.numpy as jnp
from jax.experimental import pallas as pl
from jax.experimental.pallas import tpu as pltpu

# ---------------- small synthetic config (stand-in for config.text_config) ---
B = 1
SEQ = 8
HIDDEN = 128
N_HEADS = 4
N_KV_HEADS = 2
HEAD_DIM = HIDDEN // N_HEADS          # 32
INTERMEDIATE = 256
RMS_EPS = 1e-5
ROPE_THETA = 10000.0
GROUP = N_HEADS // N_KV_HEADS
HALF = HEAD_DIM // 2

ACT_DTYPE = jnp.float32               # activations / elementwise math
MM_DTYPE = jnp.bfloat16               # matmul operand dtype (weights + casts)

Q_WIDTH = N_HEADS * HEAD_DIM          # 128
KV_WIDTH = N_KV_HEADS * HEAD_DIM      # 64


# ------------------------------- Pallas kernel -------------------------------
def block_kernel(x_ref, mask_ref, cos_ref, sneg_ref, spos_ref,
                 ln1_ref, ln2_ref,
                 wq_ref, wk_ref, wv_ref, wo_ref,
                 wg_ref, wu_ref, wd_ref,
                 out_ref, kv_ref):
    x = x_ref[0]              # (S, H) f32
    mask = mask_ref[0, 0]     # (S, S) additive mask
    ln1 = ln1_ref[...]        # (1, H)
    ln2 = ln2_ref[...]        # (1, H)

    def rms_norm(t, w):
        var = jnp.mean(t * t, axis=-1, keepdims=True)
        return t * jax.lax.rsqrt(var + RMS_EPS) * w

    def rope(t):
        # Full-width RoPE:  t*cos + roll(t,+D)*[-sin|0] + roll(t,-D)*[0|+sin]
        # (per 32-lane head block; cross-head wrap terms are multiplied by 0).
        w = t.shape[-1]
        cos = cos_ref[:, :w]
        sneg = sneg_ref[:, :w]    # -sin on first half of each head block, else 0
        spos = spos_ref[:, :w]    # +sin on second half of each head block, else 0
        return (t * cos
                + pltpu.roll(t, w - HALF, axis=1) * sneg   # brings t[j+HALF]
                + pltpu.roll(t, HALF, axis=1) * spos)      # brings t[j-HALF]

    # ---- input_layernorm + QKV projections (bf16 operands, f32 accum) --------
    h1n = rms_norm(x, ln1).astype(MM_DTYPE)
    q = jnp.dot(h1n, wq_ref[...], preferred_element_type=jnp.float32)   # (S, 128)
    k = jnp.dot(h1n, wk_ref[...], preferred_element_type=jnp.float32)   # (S, 64)
    v = jnp.dot(h1n, wv_ref[...], preferred_element_type=jnp.float32)   # (S, 64)

    # ---- RoPE once on full-width q / k; fold 1/sqrt(D) into q ----------------
    q = rope(q) * (1.0 / math.sqrt(HEAD_DIM))
    k = rope(k)

    # ---- lane-dense single-shot KV-cache write: [K | V] packed on lanes ------
    kv_ref[0] = jnp.concatenate([k, v], axis=-1).astype(kv_ref.dtype)   # (S,128)

    # ---- batched GQA attention (all heads in one einsum pair) ----------------
    q_heads = jnp.stack(
        [q[:, h * HEAD_DIM:(h + 1) * HEAD_DIM] for h in range(N_HEADS)], axis=0)
    k_heads = jnp.stack(
        [k[:, (h // GROUP) * HEAD_DIM:((h // GROUP) + 1) * HEAD_DIM]
         for h in range(N_HEADS)], axis=0)
    v_heads = jnp.stack(
        [v[:, (h // GROUP) * HEAD_DIM:((h // GROUP) + 1) * HEAD_DIM]
         for h in range(N_HEADS)], axis=0)

    scores = jnp.einsum("hqd,hkd->hqk", q_heads, k_heads,
                        preferred_element_type=jnp.float32) + mask      # (NH,S,S)
    scores = scores - jnp.max(scores, axis=-1, keepdims=True)
    p = jnp.exp(scores)
    p = p * pl.reciprocal(jnp.sum(p, axis=-1, keepdims=True), approx=True)
    attn = jnp.einsum("hqk,hkd->hqd", p, v_heads,
                      preferred_element_type=jnp.float32)               # (NH,S,D)

    # ---- single output projection (one (8,128)x(128,128) MXU op) -------------
    attn_flat = jnp.concatenate([attn[h] for h in range(N_HEADS)], axis=-1)
    o = jnp.dot(attn_flat.astype(MM_DTYPE), wo_ref[...],
                preferred_element_type=jnp.float32)                     # (S, H)

    # ---- residual + post_attention_layernorm + SwiGLU MLP + residual ---------
    r1 = x + o
    h2n = rms_norm(r1, ln2).astype(MM_DTYPE)
    gate = jnp.dot(h2n, wg_ref[...], preferred_element_type=jnp.float32)
    up = jnp.dot(h2n, wu_ref[...], preferred_element_type=jnp.float32)
    act = (jax.nn.silu(gate) * up).astype(MM_DTYPE)
    down = jnp.dot(act, wd_ref[...], preferred_element_type=jnp.float32)
    out_ref[0] = (r1 + down).astype(out_ref.dtype)


# ------------------------------- wrapper --------------------------------------
def _cost_estimate(inputs, out_shapes):
    in_bytes = sum(int(a.size) * a.dtype.itemsize for a in inputs)
    out_bytes = sum(math.prod(s.shape) * jnp.dtype(s.dtype).itemsize
                    for s in out_shapes)
    qkv = 2 * SEQ * HIDDEN * (Q_WIDTH + 2 * KV_WIDTH)
    attn = 2 * N_HEADS * (2 * SEQ * SEQ * HEAD_DIM)
    oproj = 2 * SEQ * Q_WIDTH * HIDDEN
    mlp = 3 * 2 * SEQ * HIDDEN * INTERMEDIATE
    flops = B * (qkv + attn + oproj + mlp)
    transcendentals = B * (N_HEADS * SEQ * SEQ + SEQ * INTERMEDIATE + 2 * SEQ)
    return pl.CostEstimate(flops=flops, transcendentals=transcendentals,
                           bytes_accessed=in_bytes + out_bytes)


def llama_block_forward(hidden_states, attention_mask, cos_full, sneg_full,
                        spos_full, params):
    inputs = (hidden_states, attention_mask, cos_full, sneg_full, spos_full,
              params["ln1"], params["ln2"],
              params["wq"], params["wk"], params["wv"], params["wo"],
              params["wg"], params["wu"], params["wd"])

    out_shape = (
        jax.ShapeDtypeStruct((B, SEQ, HIDDEN), hidden_states.dtype),     # hidden
        jax.ShapeDtypeStruct((B, SEQ, 2 * KV_WIDTH), hidden_states.dtype),  # [K|V]
    )

    full = lambda shape: pl.BlockSpec(shape, lambda b: (0,) * len(shape))
    in_specs = [
        pl.BlockSpec((1, SEQ, HIDDEN), lambda b: (b, 0, 0)),     # x (per batch)
        full((1, 1, SEQ, SEQ)),                                  # mask (shared)
        full((SEQ, Q_WIDTH)),                                    # cos
        full((SEQ, Q_WIDTH)),                                    # signed -sin
        full((SEQ, Q_WIDTH)),                                    # signed +sin
        full((1, HIDDEN)), full((1, HIDDEN)),                    # ln1, ln2
        full((HIDDEN, Q_WIDTH)),                                 # wq
        full((HIDDEN, KV_WIDTH)), full((HIDDEN, KV_WIDTH)),      # wk, wv
        full((Q_WIDTH, HIDDEN)),                                 # wo
        full((HIDDEN, INTERMEDIATE)), full((HIDDEN, INTERMEDIATE)),  # wg, wu
        full((INTERMEDIATE, HIDDEN)),                            # wd
    ]
    out_specs = (
        pl.BlockSpec((1, SEQ, HIDDEN), lambda b: (b, 0, 0)),
        pl.BlockSpec((1, SEQ, 2 * KV_WIDTH), lambda b: (b, 0, 0)),
    )

    out, kv = pl.pallas_call(
        block_kernel,
        out_shape=out_shape,
        grid=(B,),
        in_specs=in_specs,
        out_specs=out_specs,
        compiler_params=pltpu.CompilerParams(
            dimension_semantics=("parallel",)),
        cost_estimate=_cost_estimate(inputs, out_shape),
    )(*inputs)

    # Layout plumbing only: recover HF's (B, n_kv_heads, S, head_dim) layout.
    k_flat = kv[..., :KV_WIDTH]
    v_flat = kv[..., KV_WIDTH:]
    present_k = k_flat.reshape(B, SEQ, N_KV_HEADS, HEAD_DIM).transpose(0, 2, 1, 3)
    present_v = v_flat.reshape(B, SEQ, N_KV_HEADS, HEAD_DIM).transpose(0, 2, 1, 3)
    return out, present_k, present_v


# ------------------------- glue: rotary tables & params -----------------------
def rope_tables(seq, dim, theta=ROPE_THETA):
    # TODO(synk): Llama-3.2 applies the "llama3" rope-scaling to inv_freq; plain
    # RoPE tables are the deterministic stand-in here (matches the reference).
    inv_freq = 1.0 / (theta ** (jnp.arange(0, dim, 2, dtype=jnp.float32) / dim))
    pos = jnp.arange(seq, dtype=jnp.float32)
    freqs = jnp.outer(pos, inv_freq)                       # (S, D/2)
    emb = jnp.concatenate([freqs, freqs], axis=-1)         # (S, D)
    cos = jnp.cos(emb)
    sin = jnp.sin(emb)
    first = jnp.arange(dim) < (dim // 2)
    sin_neg = jnp.where(first, -sin, 0.0)                  # first half of block
    sin_pos = jnp.where(first, 0.0, sin)                   # second half of block
    tile = (1, N_HEADS)                                    # tile to q width; k
    return (jnp.tile(cos, tile).astype(ACT_DTYPE),         # uses leading cols
            jnp.tile(sin_neg, tile).astype(ACT_DTYPE),
            jnp.tile(sin_pos, tile).astype(ACT_DTYPE),
            cos.astype(ACT_DTYPE), sin.astype(ACT_DTYPE))


def init_params(key):
    ks = jax.random.split(key, 9)
    s = 0.02

    def w(k, shape):
        return (s * jax.random.normal(k, shape, jnp.float32)).astype(MM_DTYPE)

    return {
        "ln1": 1.0 + s * jax.random.normal(ks[0], (1, HIDDEN), jnp.float32),
        "ln2": 1.0 + s * jax.random.normal(ks[1], (1, HIDDEN), jnp.float32),
        "wq": w(ks[2], (HIDDEN, Q_WIDTH)),
        "wk": w(ks[3], (HIDDEN, KV_WIDTH)),
        "wv": w(ks[4], (HIDDEN, KV_WIDTH)),
        "wo": w(ks[5], (Q_WIDTH, HIDDEN)),
        "wg": w(ks[6], (HIDDEN, INTERMEDIATE)),
        "wu": w(ks[7], (HIDDEN, INTERMEDIATE)),
        "wd": w(ks[8], (INTERMEDIATE, HIDDEN)),
    }


# ------------------------- plain-JAX reference (for checking) -----------------
def _mm(a, w):
    # Same precision policy as the kernel: bf16 operands, f32 accumulation.
    return jnp.dot(a.astype(MM_DTYPE), w, preferred_element_type=jnp.float32)


def reference_forward(x, mask, cos, sin, p):
    def rms(t, w):
        return t * jax.lax.rsqrt(jnp.mean(t * t, -1, keepdims=True) + RMS_EPS) * w

    def rot_half(t):
        h1, h2 = jnp.split(t, 2, axis=-1)
        return jnp.concatenate([-h2, h1], axis=-1)

    hn = rms(x, p["ln1"])
    q = _mm(hn, p["wq"]).reshape(B, SEQ, N_HEADS, HEAD_DIM).transpose(0, 2, 1, 3)
    k = _mm(hn, p["wk"]).reshape(B, SEQ, N_KV_HEADS, HEAD_DIM).transpose(0, 2, 1, 3)
    v = _mm(hn, p["wv"]).reshape(B, SEQ, N_KV_HEADS, HEAD_DIM).transpose(0, 2, 1, 3)
    cb, sb = cos[None, None], sin[None, None]
    q = q * cb + rot_half(q) * sb
    k = k * cb + rot_half(k) * sb
    kr = jnp.repeat(k, GROUP, axis=1)
    vr = jnp.repeat(v, GROUP, axis=1)
    s = jnp.einsum("bhqd,bhkd->bhqk", q, kr) / math.sqrt(HEAD_DIM) + mask
    pr = jax.nn.softmax(s, axis=-1)
    a = jnp.einsum("bhqk,bhkd->bhqd", pr, vr)
    a = a.transpose(0, 2, 1, 3).reshape(B, SEQ, Q_WIDTH)
    h1 = x + _mm(a, p["wo"])
    h2 = rms(h1, p["ln2"])
    mlp = _mm(jax.nn.silu(_mm(h2, p["wg"])) * _mm(h2, p["wu"]), p["wd"])
    return h1 + mlp, k, v


# ----------------------------------- main --------------------------------------
if __name__ == "__main__":
    key = jax.random.PRNGKey(0)
    k_params, k_x = jax.random.split(key)
    params = init_params(k_params)

    hidden_states = jax.random.normal(k_x, (B, SEQ, HIDDEN), ACT_DTYPE)
    attention_mask = jnp.where(
        jnp.tril(jnp.ones((SEQ, SEQ), dtype=bool)), 0.0, -1e9
    ).astype(ACT_DTYPE)[None, None]                        # (1,1,S,S) additive causal
    cos_full, sneg_full, spos_full, cos_hd, sin_hd = rope_tables(SEQ, HEAD_DIM)

    out, present_k, present_v = llama_block_forward(
        hidden_states, attention_mask, cos_full, sneg_full, spos_full, params)
    jax.block_until_ready((out, present_k, present_v))

    ref_out, ref_k, ref_v = reference_forward(
        hidden_states, attention_mask, cos_hd, sin_hd, params)
    assert jnp.allclose(out, ref_out, rtol=1e-2, atol=1e-3), "hidden_states mismatch"
    assert jnp.allclose(present_k, ref_k, rtol=1e-2, atol=1e-3), "present_k mismatch"
    assert jnp.allclose(present_v, ref_v, rtol=1e-2, atol=1e-3), "present_v mismatch"

    print("KERNEL_OK")
</pallas_src>

<mosaic_0001>
module attributes {stable_mosaic.version = 11 : i64} {
  func.func @block_kernel(%arg0: i32, %arg1: memref<1x8x128xf32, #tpu.memory_space<vmem>>, %arg2: memref<1x1x8x8xf32, #tpu.memory_space<vmem>>, %arg3: memref<8x128xf32, #tpu.memory_space<vmem>>, %arg4: memref<8x128xf32, #tpu.memory_space<vmem>>, %arg5: memref<8x128xf32, #tpu.memory_space<vmem>>, %arg6: memref<1x128xf32, #tpu.memory_space<vmem>>, %arg7: memref<1x128xf32, #tpu.memory_space<vmem>>, %arg8: memref<128x128xbf16, #tpu.memory_space<vmem>>, %arg9: memref<128x64xbf16, #tpu.memory_space<vmem>>, %arg10: memref<128x64xbf16, #tpu.memory_space<vmem>>, %arg11: memref<128x128xbf16, #tpu.memory_space<vmem>>, %arg12: memref<128x256xbf16, #tpu.memory_space<vmem>>, %arg13: memref<128x256xbf16, #tpu.memory_space<vmem>>, %arg14: memref<256x128xbf16, #tpu.memory_space<vmem>>, %arg15: memref<1x8x128xf32, #tpu.memory_space<vmem>>, %arg16: memref<1x8x128xf32, #tpu.memory_space<vmem>>) attributes {dimension_semantics = [#tpu.dimension_semantics<parallel>], iteration_bounds = array<i64: 1>, scalar_prefetch = 0 : i64, scratch_operands = 0 : i64, tpu.core_type = #tpu.core_type<tc>, window_params = [{transform_indices = @transform_0, window_bounds = array<i64: 1, 8, 128>}, {pipeline_mode = #tpu.pipeline_mode<synchronous>, transform_indices = @transform_1, window_bounds = array<i64: 1, 1, 8, 8>}, {pipeline_mode = #tpu.pipeline_mode<synchronous>, transform_indices = @transform_2, window_bounds = array<i64: 8, 128>}, {pipeline_mode = #tpu.pipeline_mode<synchronous>, transform_indices = @transform_3, window_bounds = array<i64: 8, 128>}, {pipeline_mode = #tpu.pipeline_mode<synchronous>, transform_indices = @transform_4, window_bounds = array<i64: 8, 128>}, {pipeline_mode = #tpu.pipeline_mode<synchronous>, transform_indices = @transform_5, window_bounds = array<i64: 1, 128>}, {pipeline_mode = #tpu.pipeline_mode<synchronous>, transform_indices = @transform_6, window_bounds = array<i64: 1, 128>}, {pipeline_mode = #tpu.pipeline_mode<synchronous>, transform_indices = @transform_7, window_bounds = array<i64: 128, 128>}, {pipeline_mode = #tpu.pipeline_mode<synchronous>, transform_indices = @transform_8, window_bounds = array<i64: 128, 64>}, {pipeline_mode = #tpu.pipeline_mode<synchronous>, transform_indices = @transform_9, window_bounds = array<i64: 128, 64>}, {pipeline_mode = #tpu.pipeline_mode<synchronous>, transform_indices = @transform_10, window_bounds = array<i64: 128, 128>}, {pipeline_mode = #tpu.pipeline_mode<synchronous>, transform_indices = @transform_11, window_bounds = array<i64: 128, 256>}, {pipeline_mode = #tpu.pipeline_mode<synchronous>, transform_indices = @transform_12, window_bounds = array<i64: 128, 256>}, {pipeline_mode = #tpu.pipeline_mode<synchronous>, transform_indices = @transform_13, window_bounds = array<i64: 256, 128>}, {transform_indices = @transform_14, window_bounds = array<i64: 1, 8, 128>}, {transform_indices = @transform_15, window_bounds = array<i64: 1, 8, 128>}]} {
    %c0 = arith.constant 0 : index
    %c0_0 = arith.constant 0 : index
    %c0_1 = arith.constant 0 : index
    %0 = vector.load %arg1[%c0, %c0_0, %c0_1] : memref<1x8x128xf32, #tpu.memory_space<vmem>>, vector<1x8x128xf32>
    %1 = vector.shape_cast %0 : vector<1x8x128xf32> to vector<8x128xf32>
    %c0_2 = arith.constant 0 : index
    %c0_3 = arith.constant 0 : index
    %c0_4 = arith.constant 0 : index
    %c0_5 = arith.constant 0 : index
    %2 = vector.load %arg2[%c0_2, %c0_3, %c0_4, %c0_5] : memref<1x1x8x8xf32, #tpu.memory_space<vmem>>, vector<1x1x8x8xf32>
    %3 = vector.shape_cast %2 : vector<1x1x8x8xf32> to vector<8x8xf32>
    %c0_6 = arith.constant 0 : index
    %c0_7 = arith.constant 0 : index
    %4 = vector.load %arg6[%c0_6, %c0_7] : memref<1x128xf32, #tpu.memory_space<vmem>>, vector<1x128xf32>
    %c0_8 = arith.constant 0 : index
    %c0_9 = arith.constant 0 : index
    %5 = vector.load %arg7[%c0_8, %c0_9] : memref<1x128xf32, #tpu.memory_space<vmem>>, vector<1x128xf32>
    %6 = arith.mulf %1, %1 : vector<8x128xf32>
    %cst = arith.constant dense<0.000000e+00> : vector<8xf32>
    %7 = vector.multi_reduction <add>, %6, %cst [1] : vector<8x128xf32> to vector<8xf32>
    %8 = vector.shape_cast %7 : vector<8xf32> to vector<8x1xf32>
    %cst_10 = arith.constant 1.280000e+02 : f32
    %9 = vector.broadcast %cst_10 : f32 to vector<8x1xf32>
    %10 = arith.divf %8, %9 : vector<8x1xf32>
    %cst_11 = arith.constant 9.99999974E-6 : f32
    %11 = vector.broadcast %cst_11 : f32 to vector<8x1xf32>
    %12 = arith.addf %10, %11 : vector<8x1xf32>
    %13 = math.rsqrt %12 : vector<8x1xf32>
    %14 = vector.broadcast %13 : vector<8x1xf32> to vector<8x128xf32>
    %15 = arith.mulf %1, %14 : vector<8x128xf32>
    %16 = vector.broadcast %4 : vector<1x128xf32> to vector<8x128xf32>
    %17 = arith.mulf %15, %16 : vector<8x128xf32>
    %18 = arith.truncf %17 : vector<8x128xf32> to vector<8x128xbf16>
    %c0_12 = arith.constant 0 : index
    %c0_13 = arith.constant 0 : index
    %19 = vector.load %arg8[%c0_12, %c0_13] : memref<128x128xbf16, #tpu.memory_space<vmem>>, vector<128x128xbf16>
    %cst_14 = arith.constant dense<0.000000e+00> : vector<8x128xf32>
    %20 = tpu.matmul %18, %19, %cst_14 {dimension_numbers = #tpu.dot_dimension_numbers<[1], [0], [0], [1], [0, 0, 1, 1], [], []>} : vector<8x128xbf16>, vector<128x128xbf16>, vector<8x128xf32> -> vector<8x128xf32>
    %c0_15 = arith.constant 0 : index
    %c0_16 = arith.constant 0 : index
    %21 = vector.load %arg9[%c0_15, %c0_16] : memref<128x64xbf16, #tpu.memory_space<vmem>>, vector<128x64xbf16>
    %cst_17 = arith.constant dense<0.000000e+00> : vector<8x64xf32>
    %22 = tpu.matmul %18, %21, %cst_17 {dimension_numbers = #tpu.dot_dimension_numbers<[1], [0], [0], [1], [0, 0, 1, 1], [], []>} : vector<8x128xbf16>, vector<128x64xbf16>, vector<8x64xf32> -> vector<8x64xf32>
    %c0_18 = arith.constant 0 : index
    %c0_19 = arith.constant 0 : index
    %23 = vector.load %arg10[%c0_18, %c0_19] : memref<128x64xbf16, #tpu.memory_space<vmem>>, vector<128x64xbf16>
    %cst_20 = arith.constant dense<0.000000e+00> : vector<8x64xf32>
    %24 = tpu.matmul %18, %23, %cst_20 {dimension_numbers = #tpu.dot_dimension_numbers<[1], [0], [0], [1], [0, 0, 1, 1], [], []>} : vector<8x128xbf16>, vector<128x64xbf16>, vector<8x64xf32> -> vector<8x64xf32>
    %c0_21 = arith.constant 0 : index
    %c0_22 = arith.constant 0 : index
    %25 = vector.load %arg3[%c0_21, %c0_22] : memref<8x128xf32, #tpu.memory_space<vmem>>, vector<8x128xf32>
    %c0_23 = arith.constant 0 : index
    %c0_24 = arith.constant 0 : index
    %26 = vector.load %arg4[%c0_23, %c0_24] : memref<8x128xf32, #tpu.memory_space<vmem>>, vector<8x128xf32>
    %c0_25 = arith.constant 0 : index
    %c0_26 = arith.constant 0 : index
    %27 = vector.load %arg5[%c0_25, %c0_26] : memref<8x128xf32, #tpu.memory_space<vmem>>, vector<8x128xf32>
    %28 = arith.mulf %20, %25 : vector<8x128xf32>
    %c112_i32 = arith.constant 112 : i32
    %29 = tpu.dynamic_rotate %20 by %c112_i32 dim 1 : vector<8x128xf32>, i32 -> vector<8x128xf32>
    %30 = arith.mulf %29, %26 : vector<8x128xf32>
    %31 = arith.addf %28, %30 : vector<8x128xf32>
    %c16_i32 = arith.constant 16 : i32
    %32 = tpu.dynamic_rotate %20 by %c16_i32 dim 1 : vector<8x128xf32>, i32 -> vector<8x128xf32>
    %33 = arith.mulf %32, %27 : vector<8x128xf32>
    %34 = arith.addf %31, %33 : vector<8x128xf32>
    %cst_27 = arith.constant 0.176776692 : f32
    %35 = vector.broadcast %cst_27 : f32 to vector<8x128xf32>
    %36 = arith.mulf %34, %35 : vector<8x128xf32>
    %c0_28 = arith.constant 0 : index
    %c0_29 = arith.constant 0 : index
    %37 = vector.load %arg3[%c0_28, %c0_29] : memref<8x128xf32, #tpu.memory_space<vmem>>, vector<8x64xf32>
    %c0_30 = arith.constant 0 : index
    %c0_31 = arith.constant 0 : index
    %38 = vector.load %arg4[%c0_30, %c0_31] : memref<8x128xf32, #tpu.memory_space<vmem>>, vector<8x64xf32>
    %c0_32 = arith.constant 0 : index
    %c0_33 = arith.constant 0 : index
    %39 = vector.load %arg5[%c0_32, %c0_33] : memref<8x128xf32, #tpu.memory_space<vmem>>, vector<8x64xf32>
    %40 = arith.mulf %22, %37 : vector<8x64xf32>
    %c48_i32 = arith.constant 48 : i32
    %41 = tpu.dynamic_rotate %22 by %c48_i32 dim 1 : vector<8x64xf32>, i32 -> vector<8x64xf32>
    %42 = arith.mulf %41, %38 : vector<8x64xf32>
    %43 = arith.addf %40, %42 : vector<8x64xf32>
    %c16_i32_34 = arith.constant 16 : i32
    %44 = tpu.dynamic_rotate %22 by %c16_i32_34 dim 1 : vector<8x64xf32>, i32 -> vector<8x64xf32>
    %45 = arith.mulf %44, %39 : vector<8x64xf32>
    %46 = arith.addf %43, %45 : vector<8x64xf32>
    %47 = tpu.concatenate %46, %24 in 1 : vector<8x64xf32>, vector<8x64xf32> -> vector<8x128xf32>
    %c0_35 = arith.constant 0 : index
    %c0_36 = arith.constant 0 : index
    %c0_37 = arith.constant 0 : index
    %48 = vector.load %arg16[%c0_35, %c0_36, %c0_37] : memref<1x8x128xf32, #tpu.memory_space<vmem>>, vector<1x8x128xf32>
    %49 = vector.shape_cast %48 : vector<1x8x128xf32> to vector<8x128xf32>
    %50 = vector.shape_cast %47 : vector<8x128xf32> to vector<1x8x128xf32>
    tpu.vector_store %arg16[%c0_35, %c0_36, %c0_37], %50 {strides = array<i32>} : memref<1x8x128xf32, #tpu.memory_space<vmem>>, vector<1x8x128xf32>,
    %51 = vector.extract_strided_slice %36 {offsets = [0, 0], sizes = [8, 32], strides = [1, 1]} : vector<8x128xf32> to vector<8x32xf32>
    %52 = vector.extract_strided_slice %36 {offsets = [0, 32], sizes = [8, 32], strides = [1, 1]} : vector<8x128xf32> to vector<8x32xf32>
    %53 = vector.extract_strided_slice %36 {offsets = [0, 64], sizes = [8, 32], strides = [1, 1]} : vector<8x128xf32> to vector<8x32xf32>
    %54 = vector.extract_strided_slice %36 {offsets = [0, 96], sizes = [8, 32], strides = [1, 1]} : vector<8x128xf32> to vector<8x32xf32>
    %55 = vector.shape_cast %51 : vector<8x32xf32> to vector<1x8x32xf32>
    %56 = vector.shape_cast %52 : vector<8x32xf32> to vector<1x8x32xf32>
    %57 = vector.shape_cast %53 : vector<8x32xf32> to vector<1x8x32xf32>
    %58 = vector.shape_cast %54 : vector<8x32xf32> to vector<1x8x32xf32>
    %59 = tpu.concatenate %55, %56, %57, %58 in 0 : vector<1x8x32xf32>, vector<1x8x32xf32>, vector<1x8x32xf32>, vector<1x8x32xf32> -> vector<4x8x32xf32>
    %60 = vector.extract_strided_slice %46 {offsets = [0, 0], sizes = [8, 32], strides = [1, 1]} : vector<8x64xf32> to vector<8x32xf32>
    %61 = vector.extract_strided_slice %46 {offsets = [0, 0], sizes = [8, 32], strides = [1, 1]} : vector<8x64xf32> to vector<8x32xf32>
    %62 = vector.extract_strided_slice %46 {offsets = [0, 32], sizes = [8, 32], strides = [1, 1]} : vector<8x64xf32> to vector<8x32xf32>
    %63 = vector.extract_strided_slice %46 {offsets = [0, 32], sizes = [8, 32], strides = [1, 1]} : vector<8x64xf32> to vector<8x32xf32>
    %64 = vector.shape_cast %60 : vector<8x32xf32> to vector<1x8x32xf32>
    %65 = vector.shape_cast %61 : vector<8x32xf32> to vector<1x8x32xf32>
    %66 = vector.shape_cast %62 : vector<8x32xf32> to vector<1x8x32xf32>
    %67 = vector.shape_cast %63 : vector<8x32xf32> to vector<1x8x32xf32>
    %68 = tpu.concatenate %64, %65, %66, %67 in 0 : vector<1x8x32xf32>, vector<1x8x32xf32>, vector<1x8x32xf32>, vector<1x8x32xf32> -> vector<4x8x32xf32>
    %69 = vector.extract_strided_slice %24 {offsets = [0, 0], sizes = [8, 32], strides = [1, 1]} : vector<8x64xf32> to vector<8x32xf32>
    %70 = vector.extract_strided_slice %24 {offsets = [0, 0], sizes = [8, 32], strides = [1, 1]} : vector<8x64xf32> to vector<8x32xf32>
    %71 = vector.extract_strided_slice %24 {offsets = [0, 32], sizes = [8, 32], strides = [1, 1]} : vector<8x64xf32> to vector<8x32xf32>
    %72 = vector.extract_strided_slice %24 {offsets = [0, 32], sizes = [8, 32], strides = [1, 1]} : vector<8x64xf32> to vector<8x32xf32>
    %73 = vector.shape_cast %69 : vector<8x32xf32> to vector<1x8x32xf32>
    %74 = vector.shape_cast %70 : vector<8x32xf32> to vector<1x8x32xf32>
    %75 = vector.shape_cast %71 : vector<8x32xf32> to vector<1x8x32xf32>
    %76 = vector.shape_cast %72 : vector<8x32xf32> to vector<1x8x32xf32>
    %77 = tpu.concatenate %73, %74, %75, %76 in 0 : vector<1x8x32xf32>, vector<1x8x32xf32>, vector<1x8x32xf32>, vector<1x8x32xf32> -> vector<4x8x32xf32>
    "tpu.trace_start"() <{level = 10 : i32, message = "hqd,hkd->hqk"}> : () -> ()
    %cst_38 = arith.constant dense<0.000000e+00> : vector<4x8x8xf32>
    %78 = tpu.matmul %59, %68, %cst_38 {dimension_numbers = #tpu.dot_dimension_numbers<[2], [2], [1], [1], [0, 0, 0, 1, 1, 1], [0], [0]>} : vector<4x8x32xf32>, vector<4x8x32xf32>, vector<4x8x8xf32> -> vector<4x8x8xf32>
    "tpu.trace_stop"() : () -> ()
    %79 = vector.shape_cast %3 : vector<8x8xf32> to vector<1x8x8xf32>
    %80 = vector.broadcast %79 : vector<1x8x8xf32> to vector<4x8x8xf32>
    %81 = arith.addf %78, %80 : vector<4x8x8xf32>
    %cst_39 = arith.constant dense<0xFF800000> : vector<4x8xf32>
    %82 = vector.multi_reduction <maximumf>, %81, %cst_39 [2] : vector<4x8x8xf32> to vector<4x8xf32>
    %83 = vector.shape_cast %82 : vector<4x8xf32> to vector<4x8x1xf32>
    %84 = vector.broadcast %83 : vector<4x8x1xf32> to vector<4x8x8xf32>
    %85 = arith.subf %81, %84 : vector<4x8x8xf32>
    %86 = math.exp %85 : vector<4x8x8xf32>
    %cst_40 = arith.constant dense<0.000000e+00> : vector<4x8xf32>
    %87 = vector.multi_reduction <add>, %86, %cst_40 [2] : vector<4x8x8xf32> to vector<4x8xf32>
    %88 = vector.shape_cast %87 : vector<4x8xf32> to vector<4x8x1xf32>
    %89 = tpu.reciprocal %88 {approx = true} : vector<4x8x1xf32> -> vector<4x8x1xf32>
    %90 = vector.broadcast %89 : vector<4x8x1xf32> to vector<4x8x8xf32>
    %91 = arith.mulf %86, %90 : vector<4x8x8xf32>
    "tpu.trace_start"() <{level = 10 : i32, message = "hqk,hkd->hqd"}> : () -> ()
    %cst_41 = arith.constant dense<0.000000e+00> : vector<4x8x32xf32>
    %92 = tpu.matmul %91, %77, %cst_41 {dimension_numbers = #tpu.dot_dimension_numbers<[2], [1], [1], [2], [0, 0, 0, 1, 1, 2], [0], [0]>} : vector<4x8x8xf32>, vector<4x8x32xf32>, vector<4x8x32xf32> -> vector<4x8x32xf32>
    "tpu.trace_stop"() : () -> ()
    %93 = vector.extract_strided_slice %92 {offsets = [0, 0, 0], sizes = [1, 8, 32], strides = [1, 1, 1]} : vector<4x8x32xf32> to vector<1x8x32xf32>
    %94 = vector.shape_cast %93 : vector<1x8x32xf32> to vector<8x32xf32>
    %95 = vector.extract_strided_slice %92 {offsets = [1, 0, 0], sizes = [1, 8, 32], strides = [1, 1, 1]} : vector<4x8x32xf32> to vector<1x8x32xf32>
    %96 = vector.shape_cast %95 : vector<1x8x32xf32> to vector<8x32xf32>
    %97 = vector.extract_strided_slice %92 {offsets = [2, 0, 0], sizes = [1, 8, 32], strides = [1, 1, 1]} : vector<4x8x32xf32> to vector<1x8x32xf32>
    %98 = vector.shape_cast %97 : vector<1x8x32xf32> to vector<8x32xf32>
    %99 = vector.extract_strided_slice %92 {offsets = [3, 0, 0], sizes = [1, 8, 32], strides = [1, 1, 1]} : vector<4x8x32xf32> to vector<1x8x32xf32>
    %100 = vector.shape_cast %99 : vector<1x8x32xf32> to vector<8x32xf32>
    %101 = tpu.concatenate %94, %96, %98, %100 in 1 : vector<8x32xf32>, vector<8x32xf32>, vector<8x32xf32>, vector<8x32xf32> -> vector<8x128xf32>
    %102 = arith.truncf %101 : vector<8x128xf32> to vector<8x128xbf16>
    %c0_42 = arith.constant 0 : index
    %c0_43 = arith.constant 0 : index
    %103 = vector.load %arg11[%c0_42, %c0_43] : memref<128x128xbf16, #tpu.memory_space<vmem>>, vector<128x128xbf16>
    %cst_44 = arith.constant dense<0.000000e+00> : vector<8x128xf32>
    %104 = tpu.matmul %102, %103, %cst_44 {dimension_numbers = #tpu.dot_dimension_numbers<[1], [0], [0], [1], [0, 0, 1, 1], [], []>} : vector<8x128xbf16>, vector<128x128xbf16>, vector<8x128xf32> -> vector<8x128xf32>
    %105 = arith.addf %1, %104 : vector<8x128xf32>
    %106 = arith.mulf %105, %105 : vector<8x128xf32>
    %cst_45 = arith.constant dense<0.000000e+00> : vector<8xf32>
    %107 = vector.multi_reduction <add>, %106, %cst_45 [1] : vector<8x128xf32> to vector<8xf32>
    %108 = vector.shape_cast %107 : vector<8xf32> to vector<8x1xf32>
    %cst_46 = arith.constant 1.280000e+02 : f32
    %109 = vector.broadcast %cst_46 : f32 to vector<8x1xf32>
    %110 = arith.divf %108, %109 : vector<8x1xf32>
    %cst_47 = arith.constant 9.99999974E-6 : f32
    %111 = vector.broadcast %cst_47 : f32 to vector<8x1xf32>
    %112 = arith.addf %110, %111 : vector<8x1xf32>
    %113 = math.rsqrt %112 : vector<8x1xf32>
    %114 = vector.broadcast %113 : vector<8x1xf32> to vector<8x128xf32>
    %115 = arith.mulf %105, %114 : vector<8x128xf32>
    %116 = vector.broadcast %5 : vector<1x128xf32> to vector<8x128xf32>
    %117 = arith.mulf %115, %116 : vector<8x128xf32>
    %118 = arith.truncf %117 : vector<8x128xf32> to vector<8x128xbf16>
    %c0_48 = arith.constant 0 : index
    %c0_49 = arith.constant 0 : index
    %119 = vector.load %arg12[%c0_48, %c0_49] : memref<128x256xbf16, #tpu.memory_space<vmem>>, vector<128x256xbf16>
    %cst_50 = arith.constant dense<0.000000e+00> : vector<8x256xf32>
    %120 = tpu.matmul %118, %119, %cst_50 {dimension_numbers = #tpu.dot_dimension_numbers<[1], [0], [0], [1], [0, 0, 1, 1], [], []>} : vector<8x128xbf16>, vector<128x256xbf16>, vector<8x256xf32> -> vector<8x256xf32>
    %c0_51 = arith.constant 0 : index
    %c0_52 = arith.constant 0 : index
    %121 = vector.load %arg13[%c0_51, %c0_52] : memref<128x256xbf16, #tpu.memory_space<vmem>>, vector<128x256xbf16>
    %cst_53 = arith.constant dense<0.000000e+00> : vector<8x256xf32>
    %122 = tpu.matmul %118, %121, %cst_53 {dimension_numbers = #tpu.dot_dimension_numbers<[1], [0], [0], [1], [0, 0, 1, 1], [], []>} : vector<8x128xbf16>, vector<128x256xbf16>, vector<8x256xf32> -> vector<8x256xf32>
    %123 = arith.negf %120 : vector<8x256xf32>
    %124 = math.exp %123 : vector<8x256xf32>
    %cst_54 = arith.constant 1.000000e+00 : f32
    %125 = vector.broadcast %cst_54 : f32 to vector<8x256xf32>
    %126 = arith.addf %125, %124 : vector<8x256xf32>
    %127 = arith.divf %125, %126 : vector<8x256xf32>
    %128 = arith.mulf %120, %127 : vector<8x256xf32>
    %129 = arith.mulf %128, %122 : vector<8x256xf32>
    %130 = arith.truncf %129 : vector<8x256xf32> to vector<8x256xbf16>
    %c0_55 = arith.constant 0 : index
    %c0_56 = arith.constant 0 : index
    %131 = vector.load %arg14[%c0_55, %c0_56] : memref<256x128xbf16, #tpu.memory_space<vmem>>, vector<256x128xbf16>
    %cst_57 = arith.constant dense<0.000000e+00> : vector<8x128xf32>
    %132 = tpu.matmul %130, %131, %cst_57 {dimension_numbers = #tpu.dot_dimension_numbers<[1], [0], [0], [1], [0, 0, 1, 1], [], []>} : vector<8x256xbf16>, vector<256x128xbf16>, vector<8x128xf32> -> vector<8x128xf32>
    %133 = arith.addf %105, %132 : vector<8x128xf32>
    %c0_58 = arith.constant 0 : index
    %c0_59 = arith.constant 0 : index
    %c0_60 = arith.constant 0 : index
    %134 = vector.load %arg15[%c0_58, %c0_59, %c0_60] : memref<1x8x128xf32, #tpu.memory_space<vmem>>, vector<1x8x128xf32>
    %135 = vector.shape_cast %134 : vector<1x8x128xf32> to vector<8x128xf32>
    %136 = vector.shape_cast %133 : vector<8x128xf32> to vector<1x8x128xf32>
    tpu.vector_store %arg15[%c0_58, %c0_59, %c0_60], %136 {strides = array<i32>} : memref<1x8x128xf32, #tpu.memory_space<vmem>>, vector<1x8x128xf32>,
    return
  }
  func.func @transform_0(%arg0: i32) -> (i32, i32, i32) {
    %c0_i32 = arith.constant 0 : i32
    %c0_i32_0 = arith.constant 0 : i32
    %c0_i32_1 = arith.constant 0 : i32
    return %arg0, %c0_i32, %c0_i32_0 : i32, i32, i32
  }
  func.func @transform_1(%arg0: i32) -> (i32, i32, i32, i32) {
    %c0_i32 = arith.constant 0 : i32
    %c0_i32_0 = arith.constant 0 : i32
    %c0_i32_1 = arith.constant 0 : i32
    %c0_i32_2 = arith.constant 0 : i32
    %c0_i32_3 = arith.constant 0 : i32
    return %c0_i32, %c0_i32_0, %c0_i32_1, %c0_i32_2 : i32, i32, i32, i32
  }
  func.func @transform_2(%arg0: i32) -> (i32, i32) {
    %c0_i32 = arith.constant 0 : i32
    %c0_i32_0 = arith.constant 0 : i32
    %c0_i32_1 = arith.constant 0 : i32
    return %c0_i32, %c0_i32_0 : i32, i32
  }
  func.func @transform_3(%arg0: i32) -> (i32, i32) {
    %c0_i32 = arith.constant 0 : i32
    %c0_i32_0 = arith.constant 0 : i32
    %c0_i32_1 = arith.constant 0 : i32
    return %c0_i32, %c0_i32_0 : i32, i32
  }
  func.func @transform_4(%arg0: i32) -> (i32, i32) {
    %c0_i32 = arith.constant 0 : i32
    %c0_i32_0 = arith.constant 0 : i32
    %c0_i32_1 = arith.constant 0 : i32
    return %c0_i32, %c0_i32_0 : i32, i32
  }
  func.func @transform_5(%arg0: i32) -> (i32, i32) {
    %c0_i32 = arith.constant 0 : i32
    %c0_i32_0 = arith.constant 0 : i32
    %c0_i32_1 = arith.constant 0 : i32
    return %c0_i32, %c0_i32_0 : i32, i32
  }
  func.func @transform_6(%arg0: i32) -> (i32, i32) {
    %c0_i32 = arith.constant 0 : i32
    %c0_i32_0 = arith.constant 0 : i32
    %c0_i32_1 = arith.constant 0 : i32
    return %c0_i32, %c0_i32_0 : i32, i32
  }
  func.func @transform_7(%arg0: i32) -> (i32, i32) {
    %c0_i32 = arith.constant 0 : i32
    %c0_i32_0 = arith.constant 0 : i32
    %c0_i32_1 = arith.constant 0 : i32
    return %c0_i32, %c0_i32_0 : i32, i32
  }
  func.func @transform_8(%arg0: i32) -> (i32, i32) {
    %c0_i32 = arith.constant 0 : i32
    %c0_i32_0 = arith.constant 0 : i32
    %c0_i32_1 = arith.constant 0 : i32
    return %c0_i32, %c0_i32_0 : i32, i32
  }
  func.func @transform_9(%arg0: i32) -> (i32, i32) {
    %c0_i32 = arith.constant 0 : i32
    %c0_i32_0 = arith.constant 0 : i32
    %c0_i32_1 = arith.constant 0 : i32
    return %c0_i32, %c0_i32_0 : i32, i32
  }
  func.func @transform_10(%arg0: i32) -> (i32, i32) {
    %c0_i32 = arith.constant 0 : i32
    %c0_i32_0 = arith.constant 0 : i32
    %c0_i32_1 = arith.constant 0 : i32
    return %c0_i32, %c0_i32_0 : i32, i32
  }
  func.func @transform_11(%arg0: i32) -> (i32, i32) {
    %c0_i32 = arith.constant 0 : i32
    %c0_i32_0 = arith.constant 0 : i32
    %c0_i32_1 = arith.constant 0 : i32
    return %c0_i32, %c0_i32_0 : i32, i32
  }
  func.func @transform_12(%arg0: i32) -> (i32, i32) {
    %c0_i32 = arith.constant 0 : i32
    %c0_i32_0 = arith.constant 0 : i32
    %c0_i32_1 = arith.constant 0 : i32
    return %c0_i32, %c0_i32_0 : i32, i32
  }
  func.func @transform_13(%arg0: i32) -> (i32, i32) {
    %c0_i32 = arith.constant 0 : i32
    %c0_i32_0 = arith.constant 0 : i32
    %c0_i32_1 = arith.constant 0 : i32
    return %c0_i32, %c0_i32_0 : i32, i32
  }
  func.func @transform_14(%arg0: i32) -> (i32, i32, i32) {
    %c0_i32 = arith.constant 0 : i32
    %c0_i32_0 = arith.constant 0 : i32
    %c0_i32_1 = arith.constant 0 : i32
    return %arg0, %c0_i32, %c0_i32_0 : i32, i32, i32
  }
  func.func @transform_15(%arg0: i32) -> (i32, i32, i32) {
    %c0_i32 = arith.constant 0 : i32
    %c0_i32_0 = arith.constant 0 : i32
    %c0_i32_1 = arith.constant 0 : i32
    return %arg0, %c0_i32, %c0_i32_0 : i32, i32, i32
  }
}

</mosaic_0001>

<bundles_post_ra>
// kernel: tpu_custom_call.1
= control target key start
LH: loop header
LB: loop body
LE: loop exit
PB: predicated region body
PF: predicated region fallthrough
CT: control target
= control target key end

     0   :  { %s2768_s0 = inlined_call_operand.vmem [shape: f32[1,8,128], index: 0, kind: input, shape index: {}]   ;;  %s2769_s1 = inlined_call_operand.vmem [shape: f32[1,1,8,8], index: 1, kind: input, shape index: {}]   ;;  %s2770_s2 = inlined_call_operand.vmem [shape: f32[8,128], index: 2, kind: input, shape index: {}]   ;;  %s2771_s3 = inlined_call_operand.vmem [shape: f32[8,128], index: 3, kind: input, shape index: {}]   ;;  %s2772_s4 = inlined_call_operand.vmem [shape: f32[8,128], index: 4, kind: input, shape index: {}]   ;;  %s2773_s5 = inlined_call_operand.vmem [shape: f32[1,128], index: 5, kind: input, shape index: {}]   ;;  %s2774_s6 = inlined_call_operand.hbm [shape: f32[1,128], index: 6, kind: input, shape index: {}]   ;;  %s2775_s7 = inlined_call_operand.vmem [shape: bf16[128,128], index: 7, kind: input, shape index: {}]   ;;  %s2776_s8 = inlined_call_operand.vmem [shape: bf16[128,64], index: 8, kind: input, shape index: {}]   ;;  %s2777_s9 = inlined_call_operand.vmem [shape: bf16[128,64], index: 9, kind: input, shape index: {}]   ;;  %s2778_s10 = inlined_call_operand.hbm [shape: bf16[128,128], index: 10, kind: input, shape index: {}]   ;;  %s2779_s11 = inlined_call_operand.vmem [shape: bf16[128,256], index: 11, kind: input, shape index: {}]   ;;  %s2780_s12 = inlined_call_operand.hbm [shape: bf16[128,256], index: 12, kind: input, shape index: {}]   ;;  %s2781_s13 = inlined_call_operand.hbm [shape: bf16[256,128], index: 13, kind: input, shape index: {}]   ;;  %s2782_s14 = inlined_call_operand.hbm [shape: f32[1,8,128], index: 14, kind: output, shape index: {0}]   ;;  %s2783_s15 = inlined_call_operand.hbm [shape: f32[1,8,128], index: 15, kind: output, shape index: {1}]  }
   0x1   :  { %2785 = sst [smem:[#allocation18_spill]] %s2782_s14 }
   0x2   :  { %21 = vsyncpa [#allocation3], 0 }
   0x3   :  { %22 = vsyncpa [#allocation6], 0 }
   0x4   :  { %23 = vsyncpa [#allocation9], 0 }
   0x5   :  { %24 = vsyncpa [#allocation4], 0 }
   0x6   :  { %25 = vsyncpa [#allocation12], 0  ;;  %s2333_s18 = smov [#allocation5]   ;;  %s2191_s22 = scalar_lea.hbm %s2778_s10, 1024 }
   0x7   :  { %s59_s19 = sshll.u32 %s2333_s18, 4  ;;  %p2192_p0 = scmp.ne.s32.totalorder %s2778_s10, %s2191_s22  ;;  %s60_s19 = int_to_ptr.vmem [resolvable:$true] %s59_s19 }
   0x8   :  { %p2195_p1 = scmp.lt.u32.totalorder %s2191_s22, %s2778_s10 }
   0xa   :  { %p2197_p2 = pnand %p2195_p1, %p2192_p0 }
   0xc   :  { %2200 = shalt.err (!%p2197_p2)
}
   0xd   :  { %s2201_s27 = scalar_lea.vmem %s60_s19, 1024  ;;  %p2206_p4 = scmp.lt.s32.totalorder %s60_s19, %s60_s19 }
   0xe   :  { %p2202_p3 = scmp.ne.s32.totalorder %s60_s19, %s2201_s27  ;;  %p2207_p5 = scmp.lt.s32.totalorder %s2201_s27, %s2201_s27 }
  0x10   :  { %p2208_p6 = por %p2207_p5, %p2206_p4 }
  0x12   :  { %p2209_p7 = pnand %p2208_p6, %p2202_p3 }
  0x14   :  { %2212 = shalt.err (!%p2209_p7)
}
  0x15   :  { %s2334_s28 = smov 64   ;;  %s2335_s29 = smov 4  }
  0x16   :  { %65 = dma.hbm_to_vmem [thread:$0]  %s2778_s10, 1024, %s60_s19, [#allocation6], %s2334_s28, %s2334_s28, %s2335_s29  }
  0x17   :  { %s2336_s17 = smov [#allocation2]   ;;  %s2337_s20 = smov [#allocation7]  }
  0x18   :  { %s44_s18 = sshll.u32 %s2336_s17, 4  ;;  %s73_s21 = sshll.u32 %s2337_s20, 4  ;;  %s45_s18 = int_to_ptr.vmem [resolvable:$true] %s44_s18  ;;  %s74_s21 = int_to_ptr.vmem [resolvable:$true] %s73_s21 }
  0x19   :  { %s2213_s24 = scalar_lea.hbm %s2774_s6, 16 }
  0x1a   :  { %p2214_p8 = scmp.ne.s32.totalorder %s2774_s6, %s2213_s24  ;;  %p2217_p9 = scmp.lt.u32.totalorder %s2213_s24, %s2774_s6 }
  0x1c   :  { %p2219_p10 = pnand %p2217_p9, %p2214_p8 }
  0x1e   :  { %2222 = shalt.err (!%p2219_p10)
}
  0x1f   :  { %s2223_s10 = scalar_lea.vmem %s45_s18, 16  ;;  %s2227_s19 = scalar_lea.vmem %s45_s18, 32 }
  0x20   :  { %p2224_p11 = scmp.ne.s32.totalorder %s45_s18, %s2223_s10  ;;  %p2228_p12 = scmp.lt.s32.totalorder %s45_s18, %s45_s18 }
  0x21   :  { %p2229_p13 = scmp.lt.s32.totalorder %s2227_s19, %s2223_s10 }
  0x23   :  { %p2230_p0 = por %p2229_p13, %p2228_p12 }
  0x25   :  { %p2231_p1 = pnand %p2230_p0, %p2224_p11 }
  0x27   :  { %2234 = shalt.err (!%p2231_p1)
}
  0x28   :  { %47 = dma.hbm_to_vmem [thread:$0]  %s2774_s6, 16, %s45_s18, [#allocation3]  }
  0x29   :  { %s2235_s14 = scalar_lea.hbm %s2780_s12, 2048 }
  0x2a   :  { %p2236_p2 = scmp.ne.s32.totalorder %s2780_s12, %s2235_s14  ;;  %p2239_p3 = scmp.lt.u32.totalorder %s2235_s14, %s2780_s12 }
  0x2c   :  { %p2241_p4 = pnand %p2239_p3, %p2236_p2 }
  0x2e   :  { %2244 = shalt.err (!%p2241_p4)
}
  0x2f   :  { %s2245_s26 = scalar_lea.vmem %s74_s21, 2048  ;;  %p2250_p6 = scmp.lt.s32.totalorder %s74_s21, %s74_s21 }
  0x30   :  { %p2246_p5 = scmp.ne.s32.totalorder %s74_s21, %s2245_s26  ;;  %p2251_p7 = scmp.lt.s32.totalorder %s2245_s26, %s2245_s26 }
  0x32   :  { %p2252_p8 = por %p2251_p7, %p2250_p6 }
  0x34   :  { %p2253_p9 = pnand %p2252_p8, %p2246_p5 }
  0x36   :  { %2256 = shalt.err (!%p2253_p9)
}
  0x37   :  { %s2338_s6 = smov 128   ;;  %s2339_s18 = smov 8  }
  0x38   :  { %79 = dma.hbm_to_vmem [thread:$0]  %s2780_s12, 2048, %s74_s21, [#allocation6], %s2338_s6, %s2338_s6, %s2339_s18  }
  0x39   :  { %s2340_s19 = smov [#allocation8]   ;;  %s2257_s20 = scalar_lea.hbm %s2781_s13, 2048 }
  0x3a   :  { %s85_s30 = sshll.u32 %s2340_s19, 4  ;;  %p2258_p10 = scmp.ne.s32.totalorder %s2781_s13, %s2257_s20  ;;  %s86_s30 = int_to_ptr.vmem [resolvable:$true] %s85_s30 }
  0x3b   :  { %p2261_p11 = scmp.lt.u32.totalorder %s2257_s20, %s2781_s13 }
  0x3d   :  { %p2263_p12 = pnand %p2261_p11, %p2258_p10 }
  0x3f   :  { %2266 = shalt.err (!%p2263_p12)
}
  0x40   :  { %s2267_s25 = scalar_lea.vmem %s86_s30, 2048  ;;  %p2272_p0 = scmp.lt.s32.totalorder %s86_s30, %s86_s30 }
  0x41   :  { %p2268_p13 = scmp.ne.s32.totalorder %s86_s30, %s2267_s25  ;;  %p2273_p1 = scmp.lt.s32.totalorder %s2267_s25, %s2267_s25 }
  0x43   :  { %p2274_p2 = por %p2273_p1, %p2272_p0 }
  0x45   :  { %p2275_p3 = pnand %p2274_p2, %p2268_p13 }
  0x47   :  { %2278 = shalt.err (!%p2275_p3)
}
  0x48   :  { %91 = dma.hbm_to_vmem [thread:$0]  %s2781_s13, 2048, %s86_s30, [#allocation9], %s2334_s28, %s2334_s28, %s2335_s29  }
  0x49   :  { %2323 = dma.done.wait [#allocation3], 16  }
  0x4a   :  { %2324 = vsyncadd [#allocation3], 4294967280 }
  0x4b   :  { %2325 = dma.done.wait [#allocation6], 3072  }
  0x4c   :  { %2326 = vsyncadd [#allocation6], 4294964224 }
  0x4d   :  { %2327 = dma.done.wait [#allocation9], 2048  }
  0x4e   :  { %2328 = vsyncadd [#allocation9], 4294965248  ;;  %v2341_v0 = vmov 0.0   ;;  %v2491_v1 = vld [vmem:[%s2768_s0] sm:$0xff]  ;;  %v2069_v5 = vld [vmem:[%s2775_s7 + $0x8] sm:$0xff]   ;;  %vm2342_vm0 = vmmov 0  }
  0x4f   :  { %1928 = vmatprep.subr.bf16.mxu0 %v2341_v0  ;;  %1948 = vmatprep.subr.bf16.mxu1 %v2341_v0  ;;  %v109_v2 = vmul.f32 %v2491_v1, %v2491_v1  ;;  %v2067_v3 = vld [vmem:[%s2775_s7] sm:$0xff]   ;;  %v2070_v6 = vld [vmem:[%s2776_s8 + $0x8] sm:$0xff]   ;;  %v2071_v7 = vld [vmem:[%s2775_s7 + $0x10] sm:$0xff]   ;;  %s2343_s17 = smov 16   ;;  %vm451_vm1 = vcmask 1048064   ;;  %s2346_s22 = smov 80  }
  0x50   :  { %v2068_v4 = vld [vmem:[%s2776_s8] sm:$0xff]   ;;  %1929 = vmatpush3.bf16.msra.mxu0 %v2067_v3  ;;  %v2072_v8 = vld [vmem:[%s2776_s8 + $0x10] sm:$0xff]   ;;  %v2073_v9 = vld [vmem:[%s2775_s7 + $0x18] sm:$0xff]   ;;  %1944 = vmatprep.mubr.msk.bf16.mxu0 %vm2342_vm0, %v2341_v0  ;;  %vm498_vm2 = vcmask 261120   ;;  %vm791_vm3 = vcmask 64512   ;;  %vm482_vm4 = vcmask 523264  }
  0x51   :  { %110 = vadd.xlane.f32.xlu0 %v109_v2  ;;  %1949 = vmatpush3.bf16.msra.mxu1 %v2068_v4  ;;  %v2074_v10 = vld [vmem:[%s2776_s8 + $0x18] sm:$0xff]   ;;  %v2075_v11 = vld [vmem:[%s2775_s7 + $0x20] sm:$0xff]   ;;  %v2077_v13 = vld [vmem:[%s2775_s7 + $0x28] sm:$0xff]   ;;  %vm1142_vm5 = vcmask 785408  }
  0x52   :  { %1930 = vmatprep.subr.bf16.mxu0 %v2341_v0  ;;  %1950 = vmatprep.subr.bf16.mxu1 %v2341_v0  ;;  %v2076_v12 = vld [vmem:[%s2776_s8 + $0x20] sm:$0xff]   ;;  %v2078_v14 = vld [vmem:[%s2776_s8 + $0x28] sm:$0xff]   ;;  %v2079_v15 = vld [vmem:[%s2775_s7 + $0x30] sm:$0xff]  }
  0x53   :  { %1964 = vmatprep.mubr.msk.bf16.mxu1 %vm2342_vm0, %v2341_v0  ;;  %v2080_v16 = vld [vmem:[%s2776_s8 + $0x30] sm:$0xff]   ;;  %v2081_v17 = vld [vmem:[%s2775_s7 + $0x38] sm:$0xff]   ;;  %v1758_v23 = vld [vmem:[%s2773_s5] ss:$0 sm:$0xff]  ;;  %s2345_s7 = smov 112  }
  0x54   :  { %1931 = vmatpush3.bf16.msra.mxu0 %v2069_v5  ;;  %v2082_v18 = vld [vmem:[%s2776_s8 + $0x38] sm:$0xff]   ;;  %v2083_v26 = vld [vmem:[%s2777_s9] sm:$0xff]   ;;  %v2084_v28 = vld [vmem:[%s2777_s9 + $0x8] sm:$0xff]   ;;  %s2348_s8 = smov 32  }
  0x55   :  { %1951 = vmatpush3.bf16.msra.mxu1 %v2070_v6  ;;  %1932 = vmatprep.subr.bf16.mxu0 %v2341_v0  ;;  %v2085_v29 = vld [vmem:[%s2777_s9 + $0x10] sm:$0xff]   ;;  %v2086_v30 = vld [vmem:[%s2777_s9 + $0x18] sm:$0xff]   ;;  %v2087_v31 = vld [vmem:[%s2777_s9 + $0x20] sm:$0xff]  }
  0x56   :  { %1952 = vmatprep.subr.bf16.mxu1 %v2341_v0  ;;  %v2088_v32 = vld [vmem:[%s2777_s9 + $0x28] sm:$0xff]   ;;  %v2089_v33 = vld [vmem:[%s2777_s9 + $0x30] sm:$0xff]   ;;  %v2090_v34 = vld [vmem:[%s2777_s9 + $0x38] sm:$0xff]   ;;  %s2344_s9 = smov 48  }
  0x57   :  { %v438_v35 = vld [vmem:[%s2771_s3] sm:$0xff] }
  0x58   :  { %1933 = vmatpush3.bf16.msra.mxu0 %v2071_v7  ;;  %459 = vrot.lane.b32.xlu1 %v438_v35, %s2343_s17  ;;  %v437_v36 = vld [vmem:[%s2770_s2] sm:$0xff] }
  0x59   :  { %1953 = vmatpush3.bf16.msra.mxu1 %v2072_v8  ;;  %1934 = vmatprep.subr.bf16.mxu0 %v2341_v0  ;;  %v439_v52 = vld [vmem:[%s2772_s4] sm:$0xff]  ;;  %s2347_s4 = smov 96  }
  0x5a   :  { %1954 = vmatprep.subr.bf16.mxu1 %v2341_v0 }
  0x5c   :  { %1935 = vmatpush3.bf16.msra.mxu0 %v2073_v9 }
  0x5d   :  { %1955 = vmatpush3.bf16.msra.mxu1 %v2074_v10  ;;  %1936 = vmatprep.subr.bf16.mxu0 %v2341_v0 }
  0x5e   :  { %1956 = vmatprep.subr.bf16.mxu1 %v2341_v0 }
  0x60   :  { %1937 = vmatpush3.bf16.msra.mxu0 %v2075_v11 }
  0x61   :  { %1957 = vmatpush3.bf16.msra.mxu1 %v2076_v12  ;;  %1938 = vmatprep.subr.bf16.mxu0 %v2341_v0 }
  0x62   :  { %1958 = vmatprep.subr.bf16.mxu1 %v2341_v0 }
  0x64   :  { %1939 = vmatpush3.bf16.msra.mxu0 %v2077_v13  ;;  %v106_v13 = vld [vmem:[%s2769_s1] sm:$0xff] }
  0x65   :  { %1959 = vmatpush3.bf16.msra.mxu1 %v2078_v14  ;;  %1940 = vmatprep.subr.bf16.mxu0 %v2341_v0 }
  0x66   :  { %1960 = vmatprep.subr.bf16.mxu1 %v2341_v0 }
  0x68   :  { %1941 = vmatpush3.bf16.msra.mxu0 %v2079_v15 }
  0x69   :  { %1961 = vmatpush3.bf16.msra.mxu1 %v2080_v16  ;;  %1942 = vmatprep.subr.bf16.mxu0 %v2341_v0 }
  0x6a   :  { %1962 = vmatprep.subr.bf16.mxu1 %v2341_v0 }
  0x6c   :  { %1943 = vmatpush3.bf16.msra.mxu0 %v2081_v17 }
  0x6d   :  { %1963 = vmatpush3.bf16.msra.mxu1 %v2082_v18  ;;  %1968 = vmatprep.subr.bf16.mxu0 %v2341_v0 }
  0x6e   :  { %1988 = vmatprep.subr.mxu1 %v2341_v0 }
  0xca   :  { %v460_v53 = vpop.permute.xlu1 %459 }
  0xde   :  { %v111_v19 = vpop.xlane.xlu0 %110 }
  0xdf   :  { %v113_v20 = vmul.f32 0.0078125, %v111_v19 }
  0xe1   :  { %v114_v21 = vadd.f32 1e-05, %v113_v20 }
  0xe3   :  { %2163 = vrsqrt.f32 %v114_v21 }
  0xed   :  { %v2164_v22 = vpop.eup %2163 }
  0xee   :  { %v116_v24 = vmul.f32 %v2164_v22, %v2491_v1 }
  0xf0   :  { %v123_v25 = vmul.f32 %v1758_v23, %v116_v24 }
  0xf2   :  { %v124_v27 = vpack.c.bf16 %v123_v25, %v123_v25 }
  0xf4   :  { %1945 = vmatmul.mubr.bf16.vlgmr.msra.gmra.mrb[0].mxu0 %v124_v27  ;;  %1965 = vmatmul.mubr.bf16.vlgmr.msra.gmra.mrb[0].mxu1 %v124_v27 }
  0xf5   :  { %1969 = vmatpush3.bf16.msra.mxu0 %v2083_v26  ;;  %1984 = vmatprep.mubr.msk.bf16.mxu0 %vm2342_vm0, %v2341_v0 }
  0xf6   :  { %1970 = vmatprep.subr.bf16.mxu0 %v2341_v0  ;;  %1990 = vmatprep.mubr.msk.f32.mxu1 %vm2342_vm0, %v2341_v0 }
  0xf9   :  { %1971 = vmatpush3.bf16.msra.mxu0 %v2084_v28 }
  0xfa   :  { %1972 = vmatprep.subr.bf16.mxu0 %v2341_v0 }
  0xfd   :  { %1973 = vmatpush3.bf16.msra.mxu0 %v2085_v29 }
  0xfe   :  { %1974 = vmatprep.subr.bf16.mxu0 %v2341_v0 }
 0x101   :  { %1975 = vmatpush3.bf16.msra.mxu0 %v2086_v30 }
 0x102   :  { %1976 = vmatprep.subr.bf16.mxu0 %v2341_v0 }
 0x105   :  { %1977 = vmatpush3.bf16.msra.mxu0 %v2087_v31 }
 0x106   :  { %1978 = vmatprep.subr.bf16.mxu0 %v2341_v0 }
 0x109   :  { %1979 = vmatpush3.bf16.msra.mxu0 %v2088_v32 }
 0x10a   :  { %1980 = vmatprep.subr.bf16.mxu0 %v2341_v0 }
 0x10d   :  { %1981 = vmatpush3.bf16.msra.mxu0 %v2089_v33 }
 0x10e   :  { %1982 = vmatprep.subr.bf16.mxu0 %v2341_v0 }
 0x111   :  { %1983 = vmatpush3.bf16.msra.mxu0 %v2090_v34 }
 0x112   :  { %2028 = vmatprep.subr.bf16.mxu0 %v2341_v0 }
 0x114   :  { %1985 = vmatmul.mubr.bf16.vlgmr.msra.gmra.mrb[4].mxu0 %v124_v27 }
 0x115   :  { %2044 = vmatprep.mubr.msk.bf16.mxu0 %vm2342_vm0, %v2341_v0 }
 0x1c7   :  { %v223_v37 = vpop.f32.mrb[0].mxu0  ;;  %v327_v38 = vpop.f32.mrb[0].mxu1 }
 0x1c8   :  { %452 = vrot.lane.b32.xlu0 %v327_v38, %s2334_s28  ;;  %v1946_v39 = vpop.f32.mrb[1].mxu0  ;;  %v1966_v40 = vpop.f32.mrb[1].mxu1  ;;  %v450_v41 = vmul.f32 %v437_v36, %v327_v38  ;;  %v440_v61 = vmul.f32 %v437_v36, %v223_v37 }
 0x1c9   :  { %v226_v42 = vpop.f32.mrb[2].mxu0  ;;  %v330_v43 = vpop.f32.mrb[2].mxu1 }
 0x1ca   :  { %v1947_v44 = vpop.f32.mrb[3].mxu0  ;;  %v1967_v45 = vpop.f32.mrb[3].mxu1 }
 0x1e7   :  { %v2612_v46 = vpop.f32.mrb[4].mxu0 }
 0x1e8   :  { %v1986_v47 = vpop.f32.mrb[5].mxu0 }
 0x1e9   :  { %v434_v48 = vpop.f32.mrb[6].mxu0 }
 0x1ea   :  { %v1987_v49 = vpop.f32.mrb[7].mxu0 }
 0x23a   :  { %v453_v50 = vpop.permute.xlu0 %452 }
 0x23b   :  { %v454_v51 = vsel %vm451_vm1, %v453_v50, %v327_v38 }
 0x23c   :  { %455 = vrot.lane.b32.xlu1 %v454_v51, %s2334_s28 }
 0x240   :  { %469 = vrot.lane.b32.xlu1 %v439_v52, %s2344_s9 }
 0x244   :  { %441 = vrot.lane.b32.xlu1 %v223_v37, %s2345_s7 }
 0x248   :  { %445 = vrot.lane.b32.xlu1 %v223_v37, %s2343_s17 }
 0x2ae   :  { %v456_v54 = vpop.permute.xlu1 %455 }
 0x2af   :  { %v457_v55 = vsel %vm451_vm1, %v456_v54, %v327_v38 }
 0x2b0   :  { %v462_v56 = vmul.f32 %v460_v53, %v457_v55 }
 0x2b2   :  { %v470_v57 = vpop.permute.xlu1 %469  ;;  %464 = vrot.lane.b32.xlu1 %v462_v56, %s2345_s7 }
 0x2b3   :  { %v472_v58 = vmul.f32 %v470_v57, %v457_v55 }
 0x2b6   :  { %474 = vrot.lane.b32.xlu1 %v472_v58, %s2346_s22  ;;  %v442_v59 = vpop.permute.xlu1 %441 }
 0x2b7   :  { %v443_v60 = vmul.f32 %v442_v59, %v438_v35 }
 0x2b9   :  { %v444_v63 = vadd.f32 %v443_v60, %v440_v61 }
 0x2ba   :  { %v446_v62 = vpop.permute.xlu1 %445 }
 0x2bb   :  { %v447_v2 = vmul.f32 %v446_v62, %v439_v52 }
 0x2bd   :  { %v448_v3 = vadd.f32 %v447_v2, %v444_v63  ;;  %v2091_v2 = vld [vmem:[#allocation5] sm:$0xff]  }
 0x2be   :  { %2029 = vmatpush3.bf16.msra.mxu0 %v2091_v2 }
 0x2bf   :  { %v449_v4 = vmul.f32 0.17677669, %v448_v3  ;;  %v2092_v3 = vld [vmem:[#allocation5 + $0x8] sm:$0xff]   ;;  %2030 = vmatprep.subr.bf16.mxu0 %v2341_v0 }
 0x2c1   :  { %486 = vrot.lane.b32.xlu0 %v449_v4, %s2347_s4 }
 0x2c2   :  { %2031 = vmatpush3.bf16.msra.mxu0 %v2092_v3 }
 0x2c3   :  { %2032 = vmatprep.subr.bf16.mxu0 %v2341_v0 }
 0x2c5   :  { %488 = vrot.lane.b32.xlu0 %v449_v4, %s2334_s28 }
 0x324   :  { %v465_v5 = vpop.permute.xlu1 %464 }
 0x325   :  { %v467_v6 = vadd.f32 %v465_v5, %v450_v41 }
 0x328   :  { %v475_v7 = vpop.permute.xlu1 %474 }
 0x329   :  { %v2620_v8 = vadd.f32 %v475_v7, %v467_v6  ;;  %v2093_v6 = vld [vmem:[#allocation5 + $0x10] sm:$0xff]  }
 0x32a   :  { %2033 = vmatpush3.bf16.msra.mxu0 %v2093_v6  ;;  %v1803_v6 = vld [vmem:[#allocation2] ss:$0 sm:$0xff] }
 0x32b   :  { %493 = vrot.lane.b32.xlu1 %v2620_v8, %s2347_s4  ;;  %1989 = vmatpush3.xpose.msk.msra.mxu1 %vm498_vm2, %v2620_v8 }
 0x32c   :  { %1993 = vmatprep.subr.mxu1 %v2341_v0  ;;  %2034 = vmatprep.subr.bf16.mxu0 %v2341_v0 }
 0x32e   :  { %1991 = vmatmul.mubr.msk.f32.vlgmr.msra.gmra.mrb[4].mxu1 %vm498_vm2, %v449_v4 }
 0x32f   :  { %490 = vrot.lane.b32.xlu1 %v449_v4, %s2348_s8  ;;  %1994 = vmatpush3.xpose.msk.msra.mxu1 %vm498_vm2, %v2620_v8 }
 0x330   :  { %1995 = vmatprep.mubr.msk.f32.mxu1 %vm2342_vm0, %v2341_v0  ;;  %1998 = vmatprep.subr.mxu1 %v2341_v0 }
 0x333   :  { %v487_v9 = vpop.permute.xlu0 %486 }
 0x334   :  { %1996 = vmatmul.mubr.msk.f32.vlgmr.msra.gmra.mrb[6].mxu1 %vm498_vm2, %v487_v9  ;;  %v2094_v9 = vld [vmem:[#allocation5 + $0x18] sm:$0xff]  }
 0x335   :  { %2000 = vmatprep.mubr.msk.f32.mxu1 %vm2342_vm0, %v2341_v0  ;;  %2035 = vmatpush3.bf16.msra.mxu0 %v2094_v9 }
 0x336   :  { %2036 = vmatprep.subr.bf16.mxu0 %v2341_v0 }
 0x337   :  { %v489_v11 = vpop.permute.xlu0 %488 }
 0x39d   :  { %v494_v10 = vpop.permute.xlu1 %493 }
 0x39e   :  { %1999 = vmatpush3.xpose.msk.msra.mxu1 %vm498_vm2, %v494_v10 }
 0x39f   :  { %2003 = vmatprep.subr.mxu1 %v2341_v0 }
 0x3a1   :  { %2001 = vmatmul.mubr.msk.f32.vlgmr.msra.gmra.mrb[8].mxu1 %vm498_vm2, %v489_v11  ;;  %v491_v12 = vpop.permute.xlu1 %490  ;;  %v2095_v11 = vld [vmem:[#allocation5 + $0x20] sm:$0xff]  }
 0x3a2   :  { %2004 = vmatpush3.xpose.msk.msra.mxu1 %vm498_vm2, %v494_v10  ;;  %2005 = vmatprep.mubr.msk.f32.mxu1 %vm2342_vm0, %v2341_v0 }
 0x3a3   :  { %2008 = vmatprep.subr.mxu1 %v2341_v0  ;;  %2037 = vmatpush3.bf16.msra.mxu0 %v2095_v11  ;;  %v2147_v11 = vld [vmem:[#allocation8 + $0x40] sm:$0xff]  }
 0x3a4   :  { %2038 = vmatprep.subr.bf16.mxu0 %v2341_v0 }
 0x3a5   :  { %2006 = vmatmul.mubr.msk.f32.vlgmr.msra.gmra.mrb[10].mxu1 %vm498_vm2, %v491_v12  ;;  %v2096_v12 = vld [vmem:[#allocation5 + $0x28] sm:$0xff]  }
 0x3a6   :  { %2009 = vmatpush3.msra.mxu1 %v2612_v46  ;;  %2010 = vmatprep.mubr.msk.f32.mxu1 %vm2342_vm0, %v2341_v0 }
 0x3a7   :  { %2013 = vmatprep.subr.mxu1 %v2341_v0  ;;  %2039 = vmatpush3.bf16.msra.mxu0 %v2096_v12  ;;  %v2148_v12 = vld [vmem:[#allocation8] sm:$0xff]  }
 0x3a8   :  { %2040 = vmatprep.subr.bf16.mxu0 %v2341_v0 }
 0x401   :  { %v569_v14 = vpop.f32.mrb[4].mxu1 }
 0x402   :  { %v570_v15 = vadd.f32 %v569_v14, %v106_v13  ;;  %v1992_v16 = vpop.f32.mrb[5].mxu1  ;;  %v2098_v14 = vld [vmem:[#allocation5 + $0x38] sm:$0xff]  }
 0x404   :  { %v792_v17 = vsel %vm791_vm3, %v570_v15, -inf }
 0x405   :  { %793 = vmax.xlane.f32.xlu0 %v792_v17 }
 0x407   :  { %v641_v18 = vpop.f32.mrb[6].mxu1 }
 0x408   :  { %v642_v19 = vadd.f32 %v641_v18, %v106_v13  ;;  %v1997_v20 = vpop.f32.mrb[7].mxu1 }
 0x40a   :  { %v795_v21 = vsel %vm791_vm3, %v642_v19, -inf }
 0x40b   :  { %796 = vmax.xlane.f32.xlu1 %v795_v21 }
 0x474   :  { %v715_v22 = vpop.f32.mrb[8].mxu1 }
 0x475   :  { %v716_v23 = vadd.f32 %v715_v22, %v106_v13  ;;  %v2002_v24 = vpop.f32.mrb[9].mxu1 }
 0x477   :  { %v798_v25 = vsel %vm791_vm3, %v716_v23, -inf }
 0x478   :  { %799 = vmax.xlane.f32.xlu0 %v798_v25  ;;  %v787_v26 = vpop.f32.mrb[10].mxu1 }
 0x479   :  { %v788_v27 = vadd.f32 %v787_v26, %v106_v13  ;;  %v2007_v28 = vpop.f32.mrb[11].mxu1  ;;  %v2097_v13 = vld [vmem:[#allocation5 + $0x30] sm:$0xff]  }
 0x47a   :  { %2041 = vmatpush3.bf16.msra.mxu0 %v2097_v13  ;;  %v2102_v28 = vld [vmem:[#allocation7] ss:$8 sps:$4 sm:$0xff]  }
 0x47b   :  { %v801_v29 = vsel %vm791_vm3, %v788_v27, -inf  ;;  %2042 = vmatprep.subr.bf16.mxu0 %v2341_v0  ;;  %v2149_v13 = vld [vmem:[#allocation8 + $0x48] sm:$0xff]  }
 0x47c   :  { %802 = vmax.xlane.f32.xlu0 %v801_v29  ;;  %v2104_v29 = vld [vmem:[#allocation7 + $0x4] ss:$8 sps:$4 sm:$0xff]  }
 0x47e   :  { %2043 = vmatpush3.bf16.msra.mxu0 %v2098_v14  ;;  %v2150_v14 = vld [vmem:[#allocation8 + $0x8] sm:$0xff]  }
 0x47f   :  { %1498 = vmatprep.subr.bf16.mxu0 %v2104_v29 }
 0x492   :  { %v794_v30 = vpop.xlane.xlu0 %793 }
 0x493   :  { %v804_v31 = vsub.f32 %v570_v15, %v794_v30  ;;  %v2107_v30 = vld [vmem:[%s2779_s11 + $0x14] ss:$8 sps:$4 sm:$0xff]  }
 0x495   :  { %v808_v32 = vmul.f32 1.442695, %v804_v31  ;;  %v2110_v31 = vld [vmem:[#allocation7 + $0x14] ss:$8 sps:$4 sm:$0xff]  }
 0x497   :  { %2165 = vpow2.f32 %v808_v32  ;;  %v2108_v32 = vld [vmem:[#allocation7 + $0x10] ss:$8 sps:$4 sm:$0xff]  }
 0x498   :  { %v797_v33 = vpop.xlane.xlu1 %796 }
 0x499   :  { %v805_v34 = vsub.f32 %v642_v19, %v797_v33  ;;  %v2113_v33 = vld [vmem:[%s2779_s11 + $0x24] ss:$8 sps:$4 sm:$0xff]  }
 0x49b   :  { %v810_v35 = vmul.f32 1.442695, %v805_v34  ;;  %v2116_v34 = vld [vmem:[#allocation7 + $0x24] ss:$8 sps:$4 sm:$0xff]  }
 0x49d   :  { %2167 = vpow2.f32 %v810_v35  ;;  %v2111_v35 = vld [vmem:[%s2779_s11 + $0x20] ss:$8 sps:$4 sm:$0xff]  }
 0x4a1   :  { %v2166_v36 = vpop.eup %2165 }
 0x4a2   :  { %v816_v37 = vsel %vm791_vm3, %v2166_v36, 0.0 }
 0x4a3   :  { %817 = vadd.xlane.f32.xlu1 %v816_v37 }
 0x4a7   :  { %v2168_v38 = vpop.eup %2167 }
 0x4a8   :  { %v819_v39 = vsel %vm791_vm3, %v2168_v38, 0.0 }
 0x4a9   :  { %820 = vadd.xlane.f32.xlu0 %v819_v39 }
 0x505   :  { %v800_v40 = vpop.xlane.xlu0 %799 }
 0x506   :  { %v806_v41 = vsub.f32 %v716_v23, %v800_v40 }
 0x508   :  { %v812_v42 = vmul.f32 1.442695, %v806_v41 }
 0x509   :  { %v803_v43 = vpop.xlane.xlu0 %802 }
 0x50a   :  { %2169 = vpow2.f32 %v812_v42  ;;  %v807_v44 = vsub.f32 %v788_v27, %v803_v43  ;;  %v2099_v27 = vld [vmem:[%s2779_s11] ss:$8 sps:$4 sm:$0xff]   ;;  %v2119_v43 = vld [vmem:[%s2779_s11 + $0x34] ss:$8 sps:$4 sm:$0xff]  }
 0x50c   :  { %v814_v45 = vmul.f32 1.442695, %v807_v44  ;;  %v2122_v44 = vld [vmem:[#allocation7 + $0x34] ss:$8 sps:$4 sm:$0xff]  }
 0x50e   :  { %2171 = vpow2.f32 %v814_v45  ;;  %v2117_v45 = vld [vmem:[%s2779_s11 + $0x30] ss:$8 sps:$4 sm:$0xff]  }
 0x514   :  { %v2170_v47 = vpop.eup %2169 }
 0x515   :  { %v822_v48 = vsel %vm791_vm3, %v2170_v47, 0.0 }
 0x516   :  { %823 = vadd.xlane.f32.xlu1 %v822_v48  ;;  %v2125_v48 = vld [vmem:[%s2779_s11 + $0x44] ss:$8 sps:$4 sm:$0xff]  }
 0x518   :  { %v2172_v49 = vpop.eup %2171 }
 0x519   :  { %v825_v50 = vsel %vm791_vm3, %v2172_v49, 0.0 }
 0x51a   :  { %826 = vadd.xlane.f32.xlu0 %v825_v50  ;;  %v2128_v50 = vld [vmem:[#allocation7 + $0x44] ss:$8 sps:$4 sm:$0xff]  }
 0x527   :  { %495 = vrot.lane.b32.xlu1 %v2612_v46, %s2347_s4 }
 0x530   :  { %v818_v51 = vpop.xlane.xlu1 %817 }
 0x531   :  { %2173 = vrcp.f32 %v818_v51  ;;  %v2131_v51 = vld [vmem:[%s2779_s11 + $0x54] ss:$8 sps:$4 sm:$0xff]  }
 0x536   :  { %v821_v52 = vpop.xlane.xlu0 %820 }
 0x537   :  { %2175 = vrcp.f32 %v821_v52  ;;  %v2134_v52 = vld [vmem:[#allocation7 + $0x54] ss:$8 sps:$4 sm:$0xff]  }
 0x53b   :  { %v2174_v53 = vpop.eup %2173 }
 0x53c   :  { %v832_v54 = vmul.f32 %v2174_v53, %v2166_v36  ;;  %v2114_v36 = vld [vmem:[#allocation7 + $0x20] ss:$8 sps:$4 sm:$0xff]   ;;  %v2129_v53 = vld [vmem:[%s2779_s11 + $0x50] ss:$8 sps:$4 sm:$0xff]  }
 0x53e   :  { %2011 = vmatmul.mubr.msk.f32.vlgmr.msra.gmra.mrb[12].mxu1 %vm791_vm3, %v832_v54  ;;  %v2132_v54 = vld [vmem:[#allocation7 + $0x50] ss:$8 sps:$4 sm:$0xff]  }
 0x53f   :  { %2014 = vmatpush3.msra.mxu1 %v2612_v46  ;;  %2015 = vmatprep.mubr.msk.f32.mxu1 %vm2342_vm0, %v2341_v0 }
 0x540   :  { %2018 = vmatprep.subr.mxu1 %v2341_v0 }
 0x541   :  { %v2176_v55 = vpop.eup %2175 }
 0x542   :  { %v833_v56 = vmul.f32 %v2176_v55, %v2168_v38  ;;  %v2137_v55 = vld [vmem:[%s2779_s11 + $0x64] ss:$8 sps:$4 sm:$0xff]  }
 0x544   :  { %2016 = vmatmul.mubr.msk.f32.vlgmr.msra.gmra.mrb[14].mxu1 %vm791_vm3, %v833_v56  ;;  %v2140_v56 = vld [vmem:[#allocation7 + $0x64] ss:$8 sps:$4 sm:$0xff]  }
 0x545   :  { %2020 = vmatprep.mubr.msk.f32.mxu1 %vm2342_vm0, %v2341_v0 }
 0x5a3   :  { %v824_v57 = vpop.xlane.xlu1 %823 }
 0x5a4   :  { %2177 = vrcp.f32 %v824_v57  ;;  %v2349_v57 = vmov 0  }
 0x5a7   :  { %v827_v58 = vpop.xlane.xlu0 %826  ;;  %v496_v59 = vpop.permute.xlu1 %495 }
 0x5a8   :  { %2179 = vrcp.f32 %v827_v58  ;;  %2019 = vmatpush3.msra.mxu1 %v496_v59  ;;  %v2135_v58 = vld [vmem:[%s2779_s11 + $0x60] ss:$8 sps:$4 sm:$0xff]  }
 0x5a9   :  { %2023 = vmatprep.subr.mxu1 %v2341_v0 }
 0x5ae   :  { %v2178_v60 = vpop.eup %2177 }
 0x5af   :  { %v834_v61 = vmul.f32 %v2178_v60, %v2170_v47  ;;  %v2120_v47 = vld [vmem:[#allocation7 + $0x30] ss:$8 sps:$4 sm:$0xff]  }
 0x5b0   :  { %v2143_v60 = vld [vmem:[%s2779_s11 + $0x74] ss:$8 sps:$4 sm:$0xff]  }
 0x5b1   :  { %2021 = vmatmul.mubr.msk.f32.vlgmr.msra.gmra.mrb[16].mxu1 %vm791_vm3, %v834_v61  ;;  %v2146_v61 = vld [vmem:[#allocation7 + $0x74] ss:$8 sps:$4 sm:$0xff]  }
 0x5b2   :  { %v2180_v62 = vpop.eup %2179  ;;  %2024 = vmatpush3.msra.mxu1 %v496_v59  ;;  %2025 = vmatprep.mubr.msk.f32.mxu1 %vm2342_vm0, %v2341_v0  ;;  %v2138_v59 = vld [vmem:[#allocation7 + $0x60] ss:$8 sps:$4 sm:$0xff]  }
 0x5b3   :  { %v835_v63 = vmul.f32 %v2180_v62, %v2172_v49  ;;  %v2126_v49 = vld [vmem:[#allocation7 + $0x40] ss:$8 sps:$4 sm:$0xff]   ;;  %v2141_v62 = vld [vmem:[%s2779_s11 + $0x70] ss:$8 sps:$4 sm:$0xff]  }
 0x5b5   :  { %2026 = vmatmul.mubr.msk.f32.vlgmr.msra.gmra.mrb[18].mxu1 %vm791_vm3, %v835_v63  ;;  %v2144_v63 = vld [vmem:[#allocation7 + $0x70] ss:$8 sps:$4 sm:$0xff]  }
 0x5b6   :  { %1393 = vmatprep.mubr.bf16.mxu1 %v2349_v57 }
 0x611   :  { %v905_v4 = vpop.f32.mrb[12].mxu1 }
 0x612   :  { %v2012_v5 = vpop.f32.mrb[13].mxu1 }
 0x617   :  { %v978_v7 = vpop.f32.mrb[14].mxu1 }
 0x618   :  { %1129 = vrot.lane.b32.xlu0 %v978_v7, %s2348_s8  ;;  %v2017_v10 = vpop.f32.mrb[15].mxu1 }
 0x684   :  { %v1051_v15 = vpop.f32.mrb[16].mxu1 }
 0x685   :  { %1133 = vrot.lane.b32.xlu1 %v1051_v15, %s2334_s28  ;;  %v2022_v16 = vpop.f32.mrb[17].mxu1  ;;  %v2151_v15 = vld [vmem:[#allocation8 + $0x50] sm:$0xff]  }
 0x686   :  { %v2152_v16 = vld [vmem:[#allocation8 + $0x10] sm:$0xff]  }
 0x688   :  { %v1124_v17 = vpop.f32.mrb[18].mxu1 }
 0x689   :  { %1137 = vrot.lane.b32.xlu1 %v1124_v17, %s2347_s4  ;;  %v2027_v18 = vpop.f32.mrb[19].mxu1  ;;  %v2153_v17 = vld [vmem:[#allocation8 + $0x58] sm:$0xff]  }
 0x68a   :  { %v1130_v19 = vpop.permute.xlu0 %1129  ;;  %v2154_v18 = vld [vmem:[#allocation8 + $0x18] sm:$0xff]  }
 0x68b   :  { %v1140_v21 = vsel %vm498_vm2, %v905_v4, %v1130_v19  ;;  %v2155_v19 = vld [vmem:[#allocation8 + $0x60] sm:$0xff]  }
 0x68d   :  { %479 = vrot.lane.b32.xlu1 %v2612_v46, %s2334_s28  ;;  %v2101_v46 = vld [vmem:[%s2779_s11 + $0x4] ss:$8 sps:$4 sm:$0xff]  }
 0x68e   :  { %1361 = vmatprep.subr.bf16.mxu1 %v2101_v46 }
 0x68f   :  { %1362 = vmatpush1.bf16.msra.mxu1 %v2099_v27 }
 0x690   :  { %1363 = vmatprep.subr.bf16.mxu1 %v2107_v30 }
 0x6f7   :  { %v1134_v20 = vpop.permute.xlu1 %1133 }
 0x6f8   :  { %v1141_v0 = vsel %vm482_vm4, %v1140_v21, %v1134_v20  ;;  %v2156_v20 = vld [vmem:[#allocation8 + $0x20] sm:$0xff]   ;;  %v2157_v21 = vld [vmem:[#allocation8 + $0x68] sm:$0xff]  }
 0x6fb   :  { %v1138_v22 = vpop.permute.xlu1 %1137 }
 0x6fc   :  { %v1143_v23 = vsel %vm1142_vm5, %v1141_v0, %v1138_v22  ;;  %v2158_v0 = vld [vmem:[#allocation8 + $0x28] sm:$0xff]   ;;  %v2159_v22 = vld [vmem:[#allocation8 + $0x70] sm:$0xff]  }
 0x6fd   :  { %v1144_v24 = vpack.c.bf16 %v1143_v23, %v1143_v23  ;;  %v2160_v23 = vld [vmem:[#allocation8 + $0x30] sm:$0xff]  }
 0x6ff   :  { %2045 = vmatmul.mubr.bf16.vlgmr.msra.gmra.mrb[8].mxu0 %v1144_v24  ;;  %v480_v25 = vpop.permute.xlu1 %479  ;;  %v2161_v24 = vld [vmem:[#allocation8 + $0x78] sm:$0xff]  }
 0x700   :  { %v483_v26 = vsel %vm482_vm4, %v2620_v8, %v480_v25  ;;  %v2105_v8 = vld [vmem:[%s2779_s11 + $0x10] ss:$8 sps:$4 sm:$0xff]   ;;  %1499 = vmatpush1.bf16.msra.mxu0 %v2102_v28  ;;  %1530 = vmatprep.mubr.bf16.mxu0 %v2349_v57 }
 0x701   :  { %484 = vst [vmem:[#allocation11] sm:$0xff] %v483_v26  ;;  %1500 = vmatprep.subr.bf16.mxu0 %v2110_v31  ;;  %1364 = vmatpush1.bf16.msra.mxu1 %v2105_v8  ;;  %v2162_v25 = vld [vmem:[#allocation8 + $0x38] sm:$0xff]  }
 0x702   :  { %1365 = vmatprep.subr.bf16.mxu1 %v2113_v33 }
 0x704   :  { %1501 = vmatpush1.bf16.msra.mxu0 %v2108_v32 }
 0x705   :  { %1502 = vmatprep.subr.bf16.mxu0 %v2116_v34  ;;  %1366 = vmatpush1.bf16.msra.mxu1 %v2111_v35 }
 0x706   :  { %1367 = vmatprep.subr.bf16.mxu1 %v2119_v43 }
 0x708   :  { %1503 = vmatpush1.bf16.msra.mxu0 %v2114_v36 }
 0x709   :  { %1504 = vmatprep.subr.bf16.mxu0 %v2122_v44  ;;  %1368 = vmatpush1.bf16.msra.mxu1 %v2117_v45 }
 0x70a   :  { %1369 = vmatprep.subr.bf16.mxu1 %v2125_v48 }
 0x70c   :  { %1505 = vmatpush1.bf16.msra.mxu0 %v2120_v47 }
 0x70d   :  { %1506 = vmatprep.subr.bf16.mxu0 %v2128_v50 }
 0x710   :  { %1507 = vmatpush1.bf16.msra.mxu0 %v2126_v49 }
 0x711   :  { %1508 = vmatprep.subr.bf16.mxu0 %v2134_v52 }
 0x714   :  { %1509 = vmatpush1.bf16.msra.mxu0 %v2132_v54 }
 0x715   :  { %1510 = vmatprep.subr.bf16.mxu0 %v2140_v56 }
 0x718   :  { %1511 = vmatpush1.bf16.msra.mxu0 %v2138_v59 }
 0x719   :  { %1512 = vmatprep.subr.bf16.mxu0 %v2146_v61 }
 0x71c   :  { %1513 = vmatpush1.bf16.msra.mxu0 %v2144_v63 }
 0x7d2   :  { %v1243_v37 = vpop.f32.mrb[8].mxu0 }
 0x7d3   :  { %v2708_v38 = vadd.f32 %v1243_v37, %v2491_v1  ;;  %v2046_v39 = vpop.f32.mrb[9].mxu0  ;;  %v2123_v1 = vld [vmem:[%s2779_s11 + $0x40] ss:$8 sps:$4 sm:$0xff]   ;;  %s2350_s11 = smov [#allocation11]  }
 0x7d4   :  { %v1246_v40 = vpop.f32.mrb[10].mxu0  ;;  %1370 = vmatpush1.bf16.msra.mxu1 %v2123_v1  ;;  %s1743_s5 = sshll.u32 %s2350_s11, 4  ;;  %s1744_s5 = int_to_ptr.vmem [resolvable:$true] %s1743_s5 }
 0x7d5   :  { %v2047_v41 = vpop.f32.mrb[11].mxu0  ;;  %v1250_v42 = vmul.f32 %v2708_v38, %v2708_v38  ;;  %1371 = vmatprep.subr.bf16.mxu1 %v2131_v51  ;;  %s2279_s12 = scalar_lea.vmem %s1744_s5, 128  ;;  %p2284_p5 = scmp.lt.s32.totalorder %s1744_s5, %s1744_s5 }
 0x7d6   :  { %p2280_p4 = scmp.ne.s32.totalorder %s1744_s5, %s2279_s12  ;;  %p2285_p6 = scmp.lt.s32.totalorder %s2279_s12, %s2279_s12 }
 0x7d7   :  { %1251 = vadd.xlane.f32.xlu0 %v1250_v42 }
 0x7d8   :  { %1372 = vmatpush1.bf16.msra.mxu1 %v2129_v53  ;;  %p2286_p7 = por %p2285_p6, %p2284_p5 }
 0x7d9   :  { %1373 = vmatprep.subr.bf16.mxu1 %v2137_v55 }
 0x7da   :  { %p2287_p8 = pnand %p2286_p7, %p2280_p4 }
 0x7dc   :  { %1374 = vmatpush1.bf16.msra.mxu1 %v2135_v58 }
 0x7dd   :  { %1375 = vmatprep.subr.bf16.mxu1 %v2143_v60 }
 0x7e0   :  { %1376 = vmatpush1.bf16.msra.mxu1 %v2141_v62 }
 0x7e1   :  { %1906 = vmatprep.subr.bf16.mxu1 %v2147_v11 }
 0x864   :  { %v1252_v2 = vpop.xlane.xlu0 %1251 }
 0x865   :  { %v1253_v3 = vmul.f32 0.0078125, %v1252_v2 }
 0x867   :  { %v1254_v4 = vadd.f32 1e-05, %v1253_v3 }
 0x869   :  { %2181 = vrsqrt.f32 %v1254_v4 }
 0x873   :  { %v2182_v5 = vpop.eup %2181 }
 0x874   :  { %v1256_v7 = vmul.f32 %v2182_v5, %v2708_v38 }
 0x876   :  { %v1263_v9 = vmul.f32 %v1803_v6, %v1256_v7 }
 0x878   :  { %v1264_v10 = vpack.c.bf16 %v1263_v9, %v1263_v9 }
 0x87a   :  { %1394 = vmatmul.mubr.bf16.vlgmr.msra.gmra.mrb[20].mxu1 %v1264_v10  ;;  %1531 = vmatmul.mubr.bf16.vlgmr.msra.gmra.mrb[12].mxu0 %v1264_v10 }
 0x87b   :  { %1907 = vmatpush3.bf16.msra.mxu1 %v2148_v12 }
 0x87c   :  { %1908 = vmatprep.subr.bf16.mxu1 %v2149_v13 }
 0x87f   :  { %1909 = vmatpush3.bf16.msra.mxu1 %v2150_v14 }
 0x880   :  { %1910 = vmatprep.subr.bf16.mxu1 %v2151_v15 }
 0x883   :  { %1911 = vmatpush3.bf16.msra.mxu1 %v2152_v16 }
 0x884   :  { %1912 = vmatprep.subr.bf16.mxu1 %v2153_v17 }
 0x887   :  { %1913 = vmatpush3.bf16.msra.mxu1 %v2154_v18 }
 0x888   :  { %1914 = vmatprep.subr.bf16.mxu1 %v2155_v19 }
 0x88b   :  { %1915 = vmatpush3.bf16.msra.mxu1 %v2156_v20 }
 0x88c   :  { %1916 = vmatprep.subr.bf16.mxu1 %v2157_v21 }
 0x88f   :  { %1917 = vmatpush3.bf16.msra.mxu1 %v2158_v0 }
 0x890   :  { %1918 = vmatprep.subr.bf16.mxu1 %v2159_v22 }
 0x893   :  { %1919 = vmatpush3.bf16.msra.mxu1 %v2160_v23 }
 0x894   :  { %1920 = vmatprep.subr.bf16.mxu1 %v2161_v24 }
 0x897   :  { %1921 = vmatpush3.bf16.msra.mxu1 %v2162_v25 }
 0x94d   :  { %v1395_v26 = vpop.f32.mrb[20].mxu1  ;;  %v1532_v27 = vpop.f32.mrb[12].mxu0 }
 0x94e   :  { %v1836_v46 = vmul.f32 -1.442695, %v1395_v26  ;;  %v1397_v28 = vpop.f32.mrb[21].mxu1  ;;  %v1534_v29 = vpop.f32.mrb[13].mxu0 }
 0x94f   :  { %v1837_v30 = vmul.f32 -1.442695, %v1397_v28  ;;  %v1399_v31 = vpop.f32.mrb[22].mxu1  ;;  %v1536_v8 = vpop.f32.mrb[14].mxu0 }
 0x950   :  { %2183 = vpow2.f32 %v1836_v46  ;;  %v1400_v32 = vpop.f32.mrb[23].mxu1  ;;  %v1537_v33 = vpop.f32.mrb[15].mxu0 }
 0x951   :  { %2185 = vpow2.f32 %v1837_v30 }
 0x95a   :  { %v2184_v34 = vpop.eup %2183 }
 0x95b   :  { %v2186_v35 = vpop.eup %2185  ;;  %v1545_v36 = vadd.f32 1.0, %v2184_v34 }
 0x95c   :  { %v1546_v37 = vadd.f32 1.0, %v2186_v35 }
 0x95d   :  { %2187 = vrcp.f32 %v1545_v36 }
 0x95e   :  { %2189 = vrcp.f32 %v1546_v37 }
 0x967   :  { %v2188_v39 = vpop.eup %2187 }
 0x968   :  { %v2190_v40 = vpop.eup %2189  ;;  %v1551_v41 = vmul.f32 %v2188_v39, %v1395_v26 }
 0x969   :  { %v1552_v42 = vmul.f32 %v2190_v40, %v1397_v28 }
 0x96a   :  { %v1553_v43 = vmul.f32 %v1551_v41, %v1532_v27 }
 0x96b   :  { %v1554_v44 = vmul.f32 %v1552_v42, %v1534_v29 }
 0x96c   :  { %v1555_v47 = vpack.c.bf16 %v1553_v43, %v1553_v43 }
 0x96d   :  { %v1556_v45 = vpack.c.bf16 %v1554_v44, %v1554_v44 }
 0x96f   :  { %1717 = vmatprep.mubr.bf16.mxu1 %v1556_v45 }
 0x970   :  { %1718 = vmatmul.mubr.bf16.vlgmr.msra.gmra.mrb[24].mxu1 %v1555_v47 }
 0x971   :  { %2290 = shalt.err (!%p2287_p8)
}
 0x972   :  { %s2291_s6 = scalar_lea.hbm %s2783_s15, 128 }
 0x973   :  { %p2292_p9 = scmp.ne.s32.totalorder %s2783_s15, %s2291_s6  ;;  %p2295_p10 = scmp.lt.u32.totalorder %s2291_s6, %s2783_s15 }
 0x975   :  { %p2297_p11 = pnand %p2295_p10, %p2292_p9 }
 0x977   :  { %2300 = shalt.err (!%p2297_p11)
}
 0x978   :  { %1746 = dma.vmem_to_hbm [thread:$0]  %s1744_s5, 128, %s2783_s15, [#allocation12]  }
 0x979   :  { %s2351_s0 = smov [#allocation10]  }
 0x97a   :  { %s1733_s30 = sshll.u32 %s2351_s0, 4  ;;  %s1734_s30 = int_to_ptr.vmem [resolvable:$true] %s1733_s30 }
 0x97b   :  { %s2301_s16 = scalar_lea.vmem %s1734_s30, 128  ;;  %p2306_p13 = scmp.lt.s32.totalorder %s1734_s30, %s1734_s30 }
 0x97c   :  { %p2302_p12 = scmp.ne.s32.totalorder %s1734_s30, %s2301_s16  ;;  %p2307_p0 = scmp.lt.s32.totalorder %s2301_s16, %s2301_s16 }
 0x97e   :  { %p2308_p1 = por %p2307_p0, %p2306_p13 }
 0x980   :  { %p2309_p2 = pnand %p2308_p1, %p2302_p12 }
 0xa43   :  { %v1922_v1 = vpop.f32.mrb[24].mxu1 }
 0xa44   :  { %v1923_v48 = vpop.f32.mrb[25].mxu1 }
 0xa45   :  { %v1924_v49 = vadd.f32 %v1923_v48, %v1922_v1  ;;  %v1925_v50 = vpop.f32.mrb[26].mxu1 }
 0xa46   :  { %v1926_v51 = vpop.f32.mrb[27].mxu1 }
 0xa47   :  { %v1725_v52 = vadd.f32 %v1924_v49, %v2708_v38 }
 0xa49   :  { %1726 = vst [vmem:[#allocation10] sm:$0xff] %v1725_v52 }
 0xa4a   :  { %2312 = shalt.err (!%p2309_p2)
}
 0xa4b   :  { %s2786_s20 = sld [smem:[#allocation18_spill]] }
 0xa51   :  { %s2313_s14 = scalar_lea.hbm %s2786_s20, 128 }
 0xa52   :  { %p2314_p3 = scmp.ne.s32.totalorder %s2786_s20, %s2313_s14  ;;  %p2317_p4 = scmp.lt.u32.totalorder %s2313_s14, %s2786_s20 }
 0xa54   :  { %p2319_p5 = pnand %p2317_p4, %p2314_p3 }
 0xa56   :  { %2322 = shalt.err (!%p2319_p5)
}
 0xa57   :  { %1736 = dma.vmem_to_hbm [thread:$0]  %s1734_s30, 128, %s2786_s20, [#allocation4]  }
 0xa58   :  { %2329 = dma.done.wait [#allocation4], 128  }
 0xa59   :  { %2330 = vsyncadd [#allocation4], 4294967168 }
 0xa5a   :  { %2331 = dma.done.wait [#allocation12], 128  }
 0xa5b   :  { %2332 = vsyncadd [#allocation12], 4294967168 }
 0xa5c   :  { %1753 = vsyncpa [#allocation3], 1 }
 0xa5d   :  { %1754 = vsyncpa [#allocation6], 1 }
 0xa5e   :  { %1755 = vsyncpa [#allocation9], 1 }
 0xa5f   :  { %1756 = vsyncpa [#allocation4], 1 }
 0xa60   :  { %1757 = vsyncpa [#allocation12], 1 }

</bundles_post_ra>
